<compile_context>
chip_gen: v6e
topology: v6e:2x2x1
jax: 0.10.0
libtpu: 0.0.40
codegen_flags: <defaults>
</compile_context>

<pallas_src>
import functools

import jax
import jax.numpy as jnp
from jax.experimental import pallas as pl
from jax.experimental.pallas import tpu as pltpu


def _round_up(n, m):
    return (n + m - 1) // m * m


def _vmem_capacity_bytes():
    """Best-effort VMEM capacity query; conservative (v7x) fallback."""
    try:
        info = pltpu.get_tpu_info()
        cap = getattr(info, "vmem_capacity_bytes", None)
        if cap:
            return int(cap)
    except Exception:
        pass
    return 64 << 20


def _is_v5e():
    try:
        kind = jax.devices()[0].device_kind.lower()
    except Exception:
        return False
    return ("v5 lite" in kind) or ("v5e" in kind) or ("v5lite" in kind)


def _gating_kernel(x_ref, wr_ref, br_ref, w1_ref, b1_ref, w2_ref, b2_ref,
                   w3_ref, gsel_ref, out_ref, *, matmul_dtype, eh, split_w2):
    md = matmul_dtype
    x = x_ref[...]                                   # [TN, D] f32 (single load)
    xm = x.astype(md)

    # Router: sigmoid gates, f32.
    logits = jnp.dot(xm, wr_ref[...], preferred_element_type=jnp.float32) + br_ref[...]
    gates = 1.0 / (1.0 + jnp.exp(-logits))           # [TN, E] f32

    # One small f32 matmul (K = E) expands the gates to [TN, E*H] AND produces
    # the gate-weighted b3 term:  r = gates @ [sel | B3].
    r = jnp.dot(gates, gsel_ref[...], preferred_element_type=jnp.float32)
    gexp = r[:, :eh]                                 # [TN, EH] f32
    b3_term = r[:, eh:]                              # [TN, D]  f32

    # Fused expert stack, layer 1.
    h1 = jnp.maximum(
        jnp.dot(xm, w1_ref[...], preferred_element_type=jnp.float32) + b1_ref[...],
        0.0)                                         # [TN, EH] f32

    if split_w2:
        # v5e: two dense 128x128 diagonal quadrants of the block-diagonal W2
        # (exact; off-diagonal quadrants are zero).  Carry the halves through
        # the gate multiply and sum two partial W3 matmuls (no lane concat).
        eh2 = eh // 2
        b2 = b2_ref[...]
        y = None
        for lo, hi in ((0, eh2), (eh2, eh)):
            h2h = jnp.maximum(
                jnp.dot(h1[:, lo:hi].astype(md), w2_ref[lo:hi, lo:hi],
                        preferred_element_type=jnp.float32) + b2[:, lo:hi],
                0.0)
            h2g = (h2h * gexp[:, lo:hi]).astype(md)
            part = jnp.dot(h2g, w3_ref[lo:hi, :], preferred_element_type=jnp.float32)
            y = part if y is None else y + part
    else:
        # v6e/v7x: single 256-wide matmul maps exactly onto the 256x256 MXU.
        h2 = jnp.maximum(
            jnp.dot(h1.astype(md), w2_ref[...], preferred_element_type=jnp.float32)
            + b2_ref[...],
            0.0)
        h2g = (h2 * gexp).astype(md)
        y = jnp.dot(h2g, w3_ref[...], preferred_element_type=jnp.float32)

    out_ref[...] = (x + y + b3_term).astype(out_ref.dtype)   # residual in the store


def _fuse_params(wr, br, w1, b1, w2, b2, w3, b3, matmul_dtype):
    """Stacked per-expert params -> fused single-matmul params."""
    E, D, H = w1.shape
    EH = E * H
    w1_cat = jnp.transpose(w1, (1, 0, 2)).reshape(D, EH)                 # [D, E*H]
    b1_cat = b1.reshape(1, EH)
    w2_bd = (w2[:, :, None, :] *
             jnp.eye(E, dtype=w2.dtype)[:, None, :, None]).reshape(EH, EH)
    b2_cat = b2.reshape(1, EH)
    w3_cat = w3.reshape(EH, D)                                           # [E*H, D]
    sel = jnp.repeat(jnp.eye(E, dtype=jnp.float32), H, axis=1)           # [E, E*H]
    gsel = jnp.concatenate(
        [sel, b3.reshape(E, D).astype(jnp.float32)], axis=1)             # [E, E*H+D]
    return (wr.astype(matmul_dtype), br.reshape(1, E).astype(jnp.float32),
            w1_cat.astype(matmul_dtype), b1_cat.astype(jnp.float32),
            w2_bd.astype(matmul_dtype), b2_cat.astype(jnp.float32),
            w3_cat.astype(matmul_dtype), gsel.astype(jnp.float32))


def onehot_mlp_lsv_gating(x, wr, br, w1, b1, w2, b2, w3, b3, *,
                          block_rows=512, matmul_dtype=jnp.bfloat16,
                          split_w2=None):
    """x: [B, T, D] -> [B, T, D]."""
    B, T, D = x.shape
    E, _, H = w1.shape
    EH = E * H
    N = B * T
    x_flat = x.reshape(N, D)           # metadata reshape only, no pad / extra HBM pass

    # ---- VMEM-aware token-tile selection ------------------------------------
    capacity = _vmem_capacity_bytes()
    vmem_limit = max(32 << 20, min(int(capacity * 0.75), 128 << 20))
    bytes_md = 2 if matmul_dtype == jnp.bfloat16 else 4
    # Weights (conservatively assume double-buffered in case Buffered(1) is rejected).
    weight_bytes = 2 * (bytes_md * (D * E + D * EH + EH * EH + EH * D)
                        + 4 * (E + 2 * EH + E * (EH + D)))
    act_budget = vmem_limit - weight_bytes - (4 << 20)

    def step_bytes(tn):
        # x + out double-buffered (f32) + ~4 live [TN, EH] f32 intermediates.
        return 4 * tn * D * 4 + 4 * tn * EH * 4

    TN = _round_up(min(block_rows, N), 8)
    # Guarantee >= 2 grid steps so "parallel" shards across v7x's 2 TensorCores.
    TN = min(TN, max(8, _round_up(pl.cdiv(N, 2), 8)))
    while TN > 8 and step_bytes(TN) > act_budget:
        TN = max(8, _round_up(TN // 2, 8))
    num_blocks = pl.cdiv(N, TN)        # ragged last block handled by Pallas masking

    if split_w2 is None:
        split_w2 = _is_v5e() and (E % 2 == 0) and ((EH // 2) % 128 == 0)

    fused = _fuse_params(wr, br, w1, b1, w2, b2, w3, b3, matmul_dtype)
    kernel = functools.partial(_gating_kernel, matmul_dtype=matmul_dtype,
                               eh=EH, split_w2=split_w2)
    _const = lambda i: (0, 0)          # grid-invariant weight / bias blocks

    def _call(single_buffer_weights):
        if single_buffer_weights:
            wspec = lambda shape: pl.BlockSpec(shape, _const,
                                               pipeline_mode=pl.Buffered(1))
        else:
            wspec = lambda shape: pl.BlockSpec(shape, _const)
        return pl.pallas_call(
            kernel,
            out_shape=jax.ShapeDtypeStruct((N, D), x.dtype),
            grid_spec=pltpu.PrefetchScalarGridSpec(
                num_scalar_prefetch=0,
                grid=(num_blocks,),
                in_specs=[
                    pl.BlockSpec((TN, D), lambda i: (i, 0)),   # x tile
                    wspec((D, E)),                             # Wr
                    wspec((1, E)),                             # br
                    wspec((D, EH)),                            # W1_cat
                    wspec((1, EH)),                            # b1_cat
                    wspec((EH, EH)),                           # W2 block-diag
                    wspec((1, EH)),                            # b2_cat
                    wspec((EH, D)),                            # W3_cat
                    wspec((E, EH + D)),                        # [sel | B3]
                ],
                out_specs=pl.BlockSpec((TN, D), lambda i: (i, 0)),
            ),
            compiler_params=pltpu.CompilerParams(
                dimension_semantics=("parallel",),
                vmem_limit_bytes=int(vmem_limit)),
        )(x_flat, *fused)

    try:
        out_flat = _call(True)         # single-buffered grid-invariant weights
    except Exception:
        out_flat = _call(False)        # fallback if Buffered(1) is unsupported

    return out_flat.reshape(B, T, D)


def reference(x, wr, br, w1, b1, w2, b2, w3, b3):
    """Straight float32 port of the PyTorch forward (per-expert loop)."""
    B, T, D = x.shape
    xf = x.reshape(-1, D)
    gates = jax.nn.sigmoid(xf @ wr + br.reshape(1, -1))
    comb = jnp.zeros_like(xf)
    for e in range(w1.shape[0]):
        h1 = jnp.maximum(xf @ w1[e] + b1[e], 0.0)
        h2 = jnp.maximum(h1 @ w2[e] + b2[e], 0.0)
        o = h2 @ w3[e] + b3[e]
        comb = comb + gates[:, e:e + 1] * o
    return x + comb.reshape(B, T, D)


def reference_mirrored(x, wr, br, w1, b1, w2, b2, w3, b3, matmul_dtype):
    """Plain-JAX mirror of the fused kernel math (same casts / fusion)."""
    B, T, D = x.shape
    E, _, H = w1.shape
    EH = E * H
    (wr_m, br_f, w1_m, b1_f, w2_m, b2_f, w3_m, gsel_f) = _fuse_params(
        wr, br, w1, b1, w2, b2, w3, b3, matmul_dtype)
    xf = x.reshape(-1, D)
    xm = xf.astype(matmul_dtype)
    logits = jnp.dot(xm, wr_m, preferred_element_type=jnp.float32) + br_f
    gates = 1.0 / (1.0 + jnp.exp(-logits))
    r = jnp.dot(gates, gsel_f, preferred_element_type=jnp.float32)
    gexp, b3_term = r[:, :EH], r[:, EH:]
    h1 = jnp.maximum(jnp.dot(xm, w1_m, preferred_element_type=jnp.float32) + b1_f, 0.0)
    h2 = jnp.maximum(jnp.dot(h1.astype(matmul_dtype), w2_m,
                             preferred_element_type=jnp.float32) + b2_f, 0.0)
    h2g = (h2 * gexp).astype(matmul_dtype)
    y = jnp.dot(h2g, w3_m, preferred_element_type=jnp.float32) + b3_term
    return x + y.reshape(B, T, D)


if __name__ == "__main__":
    # Small shapes consistent with the module: B=2, T=8, n_embd=32,
    # lsv_dataset_num (num experts E) = 4, mlp_width H = 64.
    B, T, D = 2, 8, 32
    E, H = 4, 64

    key = jax.random.PRNGKey(0)
    keys = jax.random.split(key, 9)

    def uni(k, shape, fan_in):
        bound = 1.0 / (fan_in ** 0.5)
        return jax.random.uniform(k, shape, jnp.float32, -bound, bound)

    x = jax.random.normal(keys[0], (B, T, D), dtype=jnp.float32)
    wr = uni(keys[1], (D, E), D)        # router weight (input-major)
    br = uni(keys[2], (1, E), D)        # router bias
    w1 = uni(keys[3], (E, D, H), D)     # expert layer-1 weights
    b1 = uni(keys[4], (E, H), D)
    w2 = uni(keys[5], (E, H, H), H)     # expert layer-2 weights
    b2 = uni(keys[6], (E, H), H)
    w3 = uni(keys[7], (E, H, D), H)     # expert layer-3 weights
    b3 = uni(keys[8], (E, D), H)

    # 1) Full-f32 matmul path vs. the straight PyTorch-style reference.
    out_f32 = onehot_mlp_lsv_gating(x, wr, br, w1, b1, w2, b2, w3, b3,
                                    matmul_dtype=jnp.float32)
    out_f32 = jax.block_until_ready(out_f32)
    ref = reference(x, wr, br, w1, b1, w2, b2, w3, b3)
    assert out_f32.shape == (B, T, D)
    assert jnp.allclose(out_f32, ref, atol=1e-4, rtol=1e-4), (
        f"f32 max abs err {jnp.max(jnp.abs(out_f32 - ref))}")

    # 1b) Also check the v5e split-W2 path explicitly (exact math, any chip).
    out_split = onehot_mlp_lsv_gating(x, wr, br, w1, b1, w2, b2, w3, b3,
                                      matmul_dtype=jnp.float32, split_w2=True)
    out_split = jax.block_until_ready(out_split)
    assert jnp.allclose(out_split, ref, atol=1e-4, rtol=1e-4), (
        f"split-W2 max abs err {jnp.max(jnp.abs(out_split - ref))}")

    # 2) bf16-MXU-input path (the performance default) vs. a mirrored reference.
    out_bf16 = onehot_mlp_lsv_gating(x, wr, br, w1, b1, w2, b2, w3, b3,
                                     matmul_dtype=jnp.bfloat16)
    out_bf16 = jax.block_until_ready(out_bf16)
    ref_m = reference_mirrored(x, wr, br, w1, b1, w2, b2, w3, b3, jnp.bfloat16)
    assert jnp.allclose(out_bf16, ref_m, atol=5e-3, rtol=5e-3), (
        f"bf16 max abs err {jnp.max(jnp.abs(out_bf16 - ref_m))}")

    print("KERNEL_OK")
</pallas_src>

<mosaic_0001>
module attributes {stable_mosaic.version = 11 : i64} {
  func.func @_gating_kernel(%arg0: i32, %arg1: memref<8x32xf32, #tpu.memory_space<vmem>>, %arg2: memref<32x4xf32, #tpu.memory_space<vmem>>, %arg3: memref<1x4xf32, #tpu.memory_space<vmem>>, %arg4: memref<32x256xf32, #tpu.memory_space<vmem>>, %arg5: memref<1x256xf32, #tpu.memory_space<vmem>>, %arg6: memref<256x256xf32, #tpu.memory_space<vmem>>, %arg7: memref<1x256xf32, #tpu.memory_space<vmem>>, %arg8: memref<256x32xf32, #tpu.memory_space<vmem>>, %arg9: memref<4x288xf32, #tpu.memory_space<vmem>>, %arg10: memref<8x32xf32, #tpu.memory_space<vmem>>) attributes {dimension_semantics = [#tpu.dimension_semantics<parallel>], iteration_bounds = array<i64: 2>, scalar_prefetch = 0 : i64, scratch_operands = 0 : i64, tpu.core_type = #tpu.core_type<tc>, window_params = [{transform_indices = @transform_0, window_bounds = array<i64: 8, 32>}, {pipeline_mode = #tpu.pipeline_mode<synchronous>, transform_indices = @transform_1, window_bounds = array<i64: 32, 4>}, {pipeline_mode = #tpu.pipeline_mode<synchronous>, transform_indices = @transform_2, window_bounds = array<i64: 1, 4>}, {pipeline_mode = #tpu.pipeline_mode<synchronous>, transform_indices = @transform_3, window_bounds = array<i64: 32, 256>}, {pipeline_mode = #tpu.pipeline_mode<synchronous>, transform_indices = @transform_4, window_bounds = array<i64: 1, 256>}, {pipeline_mode = #tpu.pipeline_mode<synchronous>, transform_indices = @transform_5, window_bounds = array<i64: 256, 256>}, {pipeline_mode = #tpu.pipeline_mode<synchronous>, transform_indices = @transform_6, window_bounds = array<i64: 1, 256>}, {pipeline_mode = #tpu.pipeline_mode<synchronous>, transform_indices = @transform_7, window_bounds = array<i64: 256, 32>}, {pipeline_mode = #tpu.pipeline_mode<synchronous>, transform_indices = @transform_8, window_bounds = array<i64: 4, 288>}, {transform_indices = @transform_9, window_bounds = array<i64: 8, 32>}]} {
    %c0 = arith.constant 0 : index
    %c0_0 = arith.constant 0 : index
    %0 = vector.load %arg1[%c0, %c0_0] : memref<8x32xf32, #tpu.memory_space<vmem>>, vector<8x32xf32>
    %c0_1 = arith.constant 0 : index
    %c0_2 = arith.constant 0 : index
    %1 = vector.load %arg2[%c0_1, %c0_2] : memref<32x4xf32, #tpu.memory_space<vmem>>, vector<32x4xf32>
    %cst = arith.constant dense<0.000000e+00> : vector<8x4xf32>
    %2 = tpu.matmul %0, %1, %cst {dimension_numbers = #tpu.dot_dimension_numbers<[1], [0], [0], [1], [0, 0, 1, 1], [], []>} : vector<8x32xf32>, vector<32x4xf32>, vector<8x4xf32> -> vector<8x4xf32>
    %c0_3 = arith.constant 0 : index
    %c0_4 = arith.constant 0 : index
    %3 = vector.load %arg3[%c0_3, %c0_4] : memref<1x4xf32, #tpu.memory_space<vmem>>, vector<1x4xf32>
    %4 = vector.broadcast %3 : vector<1x4xf32> to vector<8x4xf32>
    %5 = arith.addf %2, %4 : vector<8x4xf32>
    %cst_5 = arith.constant 0.000000e+00 : f32
    %6 = vector.broadcast %cst_5 : f32 to vector<8x4xf32>
    %7 = arith.subf %6, %5 : vector<8x4xf32>
    %8 = math.exp %7 : vector<8x4xf32>
    %cst_6 = arith.constant 1.000000e+00 : f32
    %9 = vector.broadcast %cst_6 : f32 to vector<8x4xf32>
    %10 = arith.addf %9, %8 : vector<8x4xf32>
    %cst_7 = arith.constant 1.000000e+00 : f32
    %11 = vector.broadcast %cst_7 : f32 to vector<8x4xf32>
    %12 = arith.divf %11, %10 : vector<8x4xf32>
    %c0_8 = arith.constant 0 : index
    %c0_9 = arith.constant 0 : index
    %13 = vector.load %arg9[%c0_8, %c0_9] : memref<4x288xf32, #tpu.memory_space<vmem>>, vector<4x288xf32>
    %cst_10 = arith.constant dense<0.000000e+00> : vector<8x288xf32>
    %14 = tpu.matmul %12, %13, %cst_10 {dimension_numbers = #tpu.dot_dimension_numbers<[1], [0], [0], [1], [0, 0, 1, 1], [], []>} : vector<8x4xf32>, vector<4x288xf32>, vector<8x288xf32> -> vector<8x288xf32>
    %15 = vector.extract_strided_slice %14 {offsets = [0, 0], sizes = [8, 256], strides = [1, 1]} : vector<8x288xf32> to vector<8x256xf32>
    %16 = vector.extract_strided_slice %14 {offsets = [0, 256], sizes = [8, 32], strides = [1, 1]} : vector<8x288xf32> to vector<8x32xf32>
    %c0_11 = arith.constant 0 : index
    %c0_12 = arith.constant 0 : index
    %17 = vector.load %arg4[%c0_11, %c0_12] : memref<32x256xf32, #tpu.memory_space<vmem>>, vector<32x256xf32>
    %cst_13 = arith.constant dense<0.000000e+00> : vector<8x256xf32>
    %18 = tpu.matmul %0, %17, %cst_13 {dimension_numbers = #tpu.dot_dimension_numbers<[1], [0], [0], [1], [0, 0, 1, 1], [], []>} : vector<8x32xf32>, vector<32x256xf32>, vector<8x256xf32> -> vector<8x256xf32>
    %c0_14 = arith.constant 0 : index
    %c0_15 = arith.constant 0 : index
    %19 = vector.load %arg5[%c0_14, %c0_15] : memref<1x256xf32, #tpu.memory_space<vmem>>, vector<1x256xf32>
    %20 = vector.broadcast %19 : vector<1x256xf32> to vector<8x256xf32>
    %21 = arith.addf %18, %20 : vector<8x256xf32>
    %cst_16 = arith.constant 0.000000e+00 : f32
    %22 = vector.broadcast %cst_16 : f32 to vector<8x256xf32>
    %23 = arith.maximumf %21, %22 : vector<8x256xf32>
    %c0_17 = arith.constant 0 : index
    %c0_18 = arith.constant 0 : index
    %24 = vector.load %arg6[%c0_17, %c0_18] : memref<256x256xf32, #tpu.memory_space<vmem>>, vector<256x256xf32>
    %cst_19 = arith.constant dense<0.000000e+00> : vector<8x256xf32>
    %25 = tpu.matmul %23, %24, %cst_19 {dimension_numbers = #tpu.dot_dimension_numbers<[1], [0], [0], [1], [0, 0, 1, 1], [], []>} : vector<8x256xf32>, vector<256x256xf32>, vector<8x256xf32> -> vector<8x256xf32>
    %c0_20 = arith.constant 0 : index
    %c0_21 = arith.constant 0 : index
    %26 = vector.load %arg7[%c0_20, %c0_21] : memref<1x256xf32, #tpu.memory_space<vmem>>, vector<1x256xf32>
    %27 = vector.broadcast %26 : vector<1x256xf32> to vector<8x256xf32>
    %28 = arith.addf %25, %27 : vector<8x256xf32>
    %cst_22 = arith.constant 0.000000e+00 : f32
    %29 = vector.broadcast %cst_22 : f32 to vector<8x256xf32>
    %30 = arith.maximumf %28, %29 : vector<8x256xf32>
    %31 = arith.mulf %30, %15 : vector<8x256xf32>
    %c0_23 = arith.constant 0 : index
    %c0_24 = arith.constant 0 : index
    %32 = vector.load %arg8[%c0_23, %c0_24] : memref<256x32xf32, #tpu.memory_space<vmem>>, vector<256x32xf32>
    %cst_25 = arith.constant dense<0.000000e+00> : vector<8x32xf32>
    %33 = tpu.matmul %31, %32, %cst_25 {dimension_numbers = #tpu.dot_dimension_numbers<[1], [0], [0], [1], [0, 0, 1, 1], [], []>} : vector<8x256xf32>, vector<256x32xf32>, vector<8x32xf32> -> vector<8x32xf32>
    %34 = arith.addf %0, %33 : vector<8x32xf32>
    %35 = arith.addf %34, %16 : vector<8x32xf32>
    %c0_26 = arith.constant 0 : index
    %c0_27 = arith.constant 0 : index
    %36 = vector.load %arg10[%c0_26, %c0_27] : memref<8x32xf32, #tpu.memory_space<vmem>>, vector<8x32xf32>
    tpu.vector_store %arg10[%c0_26, %c0_27], %35 {strides = array<i32>} : memref<8x32xf32, #tpu.memory_space<vmem>>, vector<8x32xf32>,
    return
  }
  func.func @transform_0(%arg0: i32) -> (i32, i32) {
    %c0_i32 = arith.constant 0 : i32
    %c0_i32_0 = arith.constant 0 : i32
    return %arg0, %c0_i32 : i32, i32
  }
  func.func @transform_1(%arg0: i32) -> (i32, i32) {
    %c0_i32 = arith.constant 0 : i32
    %c0_i32_0 = arith.constant 0 : i32
    %c0_i32_1 = arith.constant 0 : i32
    return %c0_i32, %c0_i32_0 : i32, i32
  }
  func.func @transform_2(%arg0: i32) -> (i32, i32) {
    %c0_i32 = arith.constant 0 : i32
    %c0_i32_0 = arith.constant 0 : i32
    %c0_i32_1 = arith.constant 0 : i32
    return %c0_i32, %c0_i32_0 : i32, i32
  }
  func.func @transform_3(%arg0: i32) -> (i32, i32) {
    %c0_i32 = arith.constant 0 : i32
    %c0_i32_0 = arith.constant 0 : i32
    %c0_i32_1 = arith.constant 0 : i32
    return %c0_i32, %c0_i32_0 : i32, i32
  }
  func.func @transform_4(%arg0: i32) -> (i32, i32) {
    %c0_i32 = arith.constant 0 : i32
    %c0_i32_0 = arith.constant 0 : i32
    %c0_i32_1 = arith.constant 0 : i32
    return %c0_i32, %c0_i32_0 : i32, i32
  }
  func.func @transform_5(%arg0: i32) -> (i32, i32) {
    %c0_i32 = arith.constant 0 : i32
    %c0_i32_0 = arith.constant 0 : i32
    %c0_i32_1 = arith.constant 0 : i32
    return %c0_i32, %c0_i32_0 : i32, i32
  }
  func.func @transform_6(%arg0: i32) -> (i32, i32) {
    %c0_i32 = arith.constant 0 : i32
    %c0_i32_0 = arith.constant 0 : i32
    %c0_i32_1 = arith.constant 0 : i32
    return %c0_i32, %c0_i32_0 : i32, i32
  }
  func.func @transform_7(%arg0: i32) -> (i32, i32) {
    %c0_i32 = arith.constant 0 : i32
    %c0_i32_0 = arith.constant 0 : i32
    %c0_i32_1 = arith.constant 0 : i32
    return %c0_i32, %c0_i32_0 : i32, i32
  }
  func.func @transform_8(%arg0: i32) -> (i32, i32) {
    %c0_i32 = arith.constant 0 : i32
    %c0_i32_0 = arith.constant 0 : i32
    %c0_i32_1 = arith.constant 0 : i32
    return %c0_i32, %c0_i32_0 : i32, i32
  }
  func.func @transform_9(%arg0: i32) -> (i32, i32) {
    %c0_i32 = arith.constant 0 : i32
    %c0_i32_0 = arith.constant 0 : i32
    return %arg0, %c0_i32 : i32, i32
  }
}

module attributes {stable_mosaic.version = 11 : i64} {
  func.func @_gating_kernel(%arg0: i32, %arg1: memref<8x32xf32, #tpu.memory_space<vmem>>, %arg2: memref<32x4xf32, #tpu.memory_space<vmem>>, %arg3: memref<1x4xf32, #tpu.memory_space<vmem>>, %arg4: memref<32x256xf32, #tpu.memory_space<vmem>>, %arg5: memref<1x256xf32, #tpu.memory_space<vmem>>, %arg6: memref<256x256xf32, #tpu.memory_space<vmem>>, %arg7: memref<1x256xf32, #tpu.memory_space<vmem>>, %arg8: memref<256x32xf32, #tpu.memory_space<vmem>>, %arg9: memref<4x288xf32, #tpu.memory_space<vmem>>, %arg10: memref<8x32xf32, #tpu.memory_space<vmem>>) attributes {dimension_semantics = [#tpu.dimension_semantics<parallel>], iteration_bounds = array<i64: 2>, scalar_prefetch = 0 : i64, scratch_operands = 0 : i64, tpu.core_type = #tpu.core_type<tc>, window_params = [{transform_indices = @transform_0, window_bounds = array<i64: 8, 32>}, {pipeline_mode = #tpu.pipeline_mode<synchronous>, transform_indices = @transform_1, window_bounds = array<i64: 32, 4>}, {pipeline_mode = #tpu.pipeline_mode<synchronous>, transform_indices = @transform_2, window_bounds = array<i64: 1, 4>}, {pipeline_mode = #tpu.pipeline_mode<synchronous>, transform_indices = @transform_3, window_bounds = array<i64: 32, 256>}, {pipeline_mode = #tpu.pipeline_mode<synchronous>, transform_indices = @transform_4, window_bounds = array<i64: 1, 256>}, {pipeline_mode = #tpu.pipeline_mode<synchronous>, transform_indices = @transform_5, window_bounds = array<i64: 256, 256>}, {pipeline_mode = #tpu.pipeline_mode<synchronous>, transform_indices = @transform_6, window_bounds = array<i64: 1, 256>}, {pipeline_mode = #tpu.pipeline_mode<synchronous>, transform_indices = @transform_7, window_bounds = array<i64: 256, 32>}, {pipeline_mode = #tpu.pipeline_mode<synchronous>, transform_indices = @transform_8, window_bounds = array<i64: 4, 288>}, {transform_indices = @transform_9, window_bounds = array<i64: 8, 32>}]} {
    %c0 = arith.constant 0 : index
    %c0_0 = arith.constant 0 : index
    %0 = vector.load %arg1[%c0, %c0_0] : memref<8x32xf32, #tpu.memory_space<vmem>>, vector<8x32xf32>
    %c0_1 = arith.constant 0 : index
    %c0_2 = arith.constant 0 : index
    %1 = vector.load %arg2[%c0_1, %c0_2] : memref<32x4xf32, #tpu.memory_space<vmem>>, vector<32x4xf32>
    %cst = arith.constant dense<0.000000e+00> : vector<8x4xf32>
    %2 = tpu.matmul %0, %1, %cst {dimension_numbers = #tpu.dot_dimension_numbers<[1], [0], [0], [1], [0, 0, 1, 1], [], []>} : vector<8x32xf32>, vector<32x4xf32>, vector<8x4xf32> -> vector<8x4xf32>
    %c0_3 = arith.constant 0 : index
    %c0_4 = arith.constant 0 : index
    %3 = vector.load %arg3[%c0_3, %c0_4] : memref<1x4xf32, #tpu.memory_space<vmem>>, vector<1x4xf32>
    %4 = vector.broadcast %3 : vector<1x4xf32> to vector<8x4xf32>
    %5 = arith.addf %2, %4 : vector<8x4xf32>
    %cst_5 = arith.constant 0.000000e+00 : f32
    %6 = vector.broadcast %cst_5 : f32 to vector<8x4xf32>
    %7 = arith.subf %6, %5 : vector<8x4xf32>
    %8 = math.exp %7 : vector<8x4xf32>
    %cst_6 = arith.constant 1.000000e+00 : f32
    %9 = vector.broadcast %cst_6 : f32 to vector<8x4xf32>
    %10 = arith.addf %9, %8 : vector<8x4xf32>
    %cst_7 = arith.constant 1.000000e+00 : f32
    %11 = vector.broadcast %cst_7 : f32 to vector<8x4xf32>
    %12 = arith.divf %11, %10 : vector<8x4xf32>
    %c0_8 = arith.constant 0 : index
    %c0_9 = arith.constant 0 : index
    %13 = vector.load %arg9[%c0_8, %c0_9] : memref<4x288xf32, #tpu.memory_space<vmem>>, vector<4x288xf32>
    %cst_10 = arith.constant dense<0.000000e+00> : vector<8x288xf32>
    %14 = tpu.matmul %12, %13, %cst_10 {dimension_numbers = #tpu.dot_dimension_numbers<[1], [0], [0], [1], [0, 0, 1, 1], [], []>} : vector<8x4xf32>, vector<4x288xf32>, vector<8x288xf32> -> vector<8x288xf32>
    %15 = vector.extract_strided_slice %14 {offsets = [0, 0], sizes = [8, 256], strides = [1, 1]} : vector<8x288xf32> to vector<8x256xf32>
    %16 = vector.extract_strided_slice %14 {offsets = [0, 256], sizes = [8, 32], strides = [1, 1]} : vector<8x288xf32> to vector<8x32xf32>
    %c0_11 = arith.constant 0 : index
    %c0_12 = arith.constant 0 : index
    %17 = vector.load %arg4[%c0_11, %c0_12] : memref<32x256xf32, #tpu.memory_space<vmem>>, vector<32x256xf32>
    %cst_13 = arith.constant dense<0.000000e+00> : vector<8x256xf32>
    %18 = tpu.matmul %0, %17, %cst_13 {dimension_numbers = #tpu.dot_dimension_numbers<[1], [0], [0], [1], [0, 0, 1, 1], [], []>} : vector<8x32xf32>, vector<32x256xf32>, vector<8x256xf32> -> vector<8x256xf32>
    %c0_14 = arith.constant 0 : index
    %c0_15 = arith.constant 0 : index
    %19 = vector.load %arg5[%c0_14, %c0_15] : memref<1x256xf32, #tpu.memory_space<vmem>>, vector<1x256xf32>
    %20 = vector.broadcast %19 : vector<1x256xf32> to vector<8x256xf32>
    %21 = arith.addf %18, %20 : vector<8x256xf32>
    %cst_16 = arith.constant 0.000000e+00 : f32
    %22 = vector.broadcast %cst_16 : f32 to vector<8x256xf32>
    %23 = arith.maximumf %21, %22 : vector<8x256xf32>
    %c0_17 = arith.constant 0 : index
    %c0_18 = arith.constant 0 : index
    %24 = vector.load %arg6[%c0_17, %c0_18] : memref<256x256xf32, #tpu.memory_space<vmem>>, vector<256x256xf32>
    %cst_19 = arith.constant dense<0.000000e+00> : vector<8x256xf32>
    %25 = tpu.matmul %23, %24, %cst_19 {dimension_numbers = #tpu.dot_dimension_numbers<[1], [0], [0], [1], [0, 0, 1, 1], [], []>} : vector<8x256xf32>, vector<256x256xf32>, vector<8x256xf32> -> vector<8x256xf32>
    %c0_20 = arith.constant 0 : index
    %c0_21 = arith.constant 0 : index
    %26 = vector.load %arg7[%c0_20, %c0_21] : memref<1x256xf32, #tpu.memory_space<vmem>>, vector<1x256xf32>
    %27 = vector.broadcast %26 : vector<1x256xf32> to vector<8x256xf32>
    %28 = arith.addf %25, %27 : vector<8x256xf32>
    %cst_22 = arith.constant 0.000000e+00 : f32
    %29 = vector.broadcast %cst_22 : f32 to vector<8x256xf32>
    %30 = arith.maximumf %28, %29 : vector<8x256xf32>
    %31 = arith.mulf %30, %15 : vector<8x256xf32>
    %c0_23 = arith.constant 0 : index
    %c0_24 = arith.constant 0 : index
    %32 = vector.load %arg8[%c0_23, %c0_24] : memref<256x32xf32, #tpu.memory_space<vmem>>, vector<256x32xf32>
    %cst_25 = arith.constant dense<0.000000e+00> : vector<8x32xf32>
    %33 = tpu.matmul %31, %32, %cst_25 {dimension_numbers = #tpu.dot_dimension_numbers<[1], [0], [0], [1], [0, 0, 1, 1], [], []>} : vector<8x256xf32>, vector<256x32xf32>, vector<8x32xf32> -> vector<8x32xf32>
    %34 = arith.addf %0, %33 : vector<8x32xf32>
    %35 = arith.addf %34, %16 : vector<8x32xf32>
    %c0_26 = arith.constant 0 : index
    %c0_27 = arith.constant 0 : index
    %36 = vector.load %arg10[%c0_26, %c0_27] : memref<8x32xf32, #tpu.memory_space<vmem>>, vector<8x32xf32>
    tpu.vector_store %arg10[%c0_26, %c0_27], %35 {strides = array<i32>} : memref<8x32xf32, #tpu.memory_space<vmem>>, vector<8x32xf32>,
    return
  }
  func.func @transform_0(%arg0: i32) -> (i32, i32) {
    %c0_i32 = arith.constant 0 : i32
    %c0_i32_0 = arith.constant 0 : i32
    return %arg0, %c0_i32 : i32, i32
  }
  func.func @transform_1(%arg0: i32) -> (i32, i32) {
    %c0_i32 = arith.constant 0 : i32
    %c0_i32_0 = arith.constant 0 : i32
    %c0_i32_1 = arith.constant 0 : i32
    return %c0_i32, %c0_i32_0 : i32, i32
  }
  func.func @transform_2(%arg0: i32) -> (i32, i32) {
    %c0_i32 = arith.constant 0 : i32
    %c0_i32_0 = arith.constant 0 : i32
    %c0_i32_1 = arith.constant 0 : i32
    return %c0_i32, %c0_i32_0 : i32, i32
  }
  func.func @transform_3(%arg0: i32) -> (i32, i32) {
    %c0_i32 = arith.constant 0 : i32
    %c0_i32_0 = arith.constant 0 : i32
    %c0_i32_1 = arith.constant 0 : i32
    return %c0_i32, %c0_i32_0 : i32, i32
  }
  func.func @transform_4(%arg0: i32) -> (i32, i32) {
    %c0_i32 = arith.constant 0 : i32
    %c0_i32_0 = arith.constant 0 : i32
    %c0_i32_1 = arith.constant 0 : i32
    return %c0_i32, %c0_i32_0 : i32, i32
  }
  func.func @transform_5(%arg0: i32) -> (i32, i32) {
    %c0_i32 = arith.constant 0 : i32
    %c0_i32_0 = arith.constant 0 : i32
    %c0_i32_1 = arith.constant 0 : i32
    return %c0_i32, %c0_i32_0 : i32, i32
  }
  func.func @transform_6(%arg0: i32) -> (i32, i32) {
    %c0_i32 = arith.constant 0 : i32
    %c0_i32_0 = arith.constant 0 : i32
    %c0_i32_1 = arith.constant 0 : i32
    return %c0_i32, %c0_i32_0 : i32, i32
  }
  func.func @transform_7(%arg0: i32) -> (i32, i32) {
    %c0_i32 = arith.constant 0 : i32
    %c0_i32_0 = arith.constant 0 : i32
    %c0_i32_1 = arith.constant 0 : i32
    return %c0_i32, %c0_i32_0 : i32, i32
  }
  func.func @transform_8(%arg0: i32) -> (i32, i32) {
    %c0_i32 = arith.constant 0 : i32
    %c0_i32_0 = arith.constant 0 : i32
    %c0_i32_1 = arith.constant 0 : i32
    return %c0_i32, %c0_i32_0 : i32, i32
  }
  func.func @transform_9(%arg0: i32) -> (i32, i32) {
    %c0_i32 = arith.constant 0 : i32
    %c0_i32_0 = arith.constant 0 : i32
    return %arg0, %c0_i32 : i32, i32
  }
}

</mosaic_0001>

<bundles_post_ra>
// kernel: tpu_custom_call.1
= control target key start
LH: loop header
LB: loop body
LE: loop exit
PB: predicated region body
PF: predicated region fallthrough
CT: control target
= control target key end

     0   :  { %14 = vsyncpa [#allocation3], 0  ;;  %s1585_s0 = inlined_call_operand.vmem [shape: f32[16,32], index: 0, kind: input, shape index: {}]   ;;  %s1586_s1 = inlined_call_operand.vmem [shape: f32[32,4], index: 1, kind: input, shape index: {}]   ;;  %s1587_s2 = inlined_call_operand.vmem [shape: f32[1,4], index: 2, kind: input, shape index: {}]   ;;  %s1588_s3 = inlined_call_operand.vmem [shape: f32[32,256], index: 3, kind: input, shape index: {}]   ;;  %s1589_s4 = inlined_call_operand.vmem [shape: f32[1,256], index: 4, kind: input, shape index: {}]   ;;  %s1590_s5 = inlined_call_operand.hbm [shape: f32[256,256], index: 5, kind: input, shape index: {}]   ;;  %s1591_s6 = inlined_call_operand.vmem [shape: f32[1,256], index: 6, kind: input, shape index: {}]   ;;  %s1592_s7 = inlined_call_operand.vmem [shape: f32[256,32], index: 7, kind: input, shape index: {}]   ;;  %s1593_s8 = inlined_call_operand.vmem [shape: f32[4,288], index: 8, kind: input, shape index: {}]   ;;  %s1594_s9 = inlined_call_operand.hbm [shape: f32[16,32], index: 9, kind: output, shape index: {}]  }
   0x1   :  { %15 = vsyncpa [#allocation4], 0 }
   0x2   :  { %17 = vsyncpa [#allocation4 + $0x1], 0  ;;  %s1311_s30 = smov 0   ;;  %s1313_s10 = smov 0  }
   0x3   :  { %s1315_s11 = smov 0   ;;  %s1317_s12 = smov 0  }
   0x4 LB: > { %s1332_s13 = sadd.s32 4294967295, %s1253_s12   ;;  %s1026_s14 = sadd.s32 4294967294, %s1253_s12   ;;  %s1253_s12 = sphi %s1317_s12, %s1602_s12   ;;  %s1249_s11 = sphi %s1315_s11, %s1601_s11   ;;  %s1245_s10 = sphi %s1313_s10, %s1600_s10   ;;  %s1241_s30 = sphi %s1311_s30, %s1599_s30  }
   0x5   : > { %s1336_s15 = sadd.s32 1, %s1253_s12   ;;  %s224_s16 = sadd.s32 1, %s1249_s11 }
   0x6   : > { %s221_s17 = ssub.s32 %s1253_s12, %s1336_s15  ;;  %p234_p0 = scmp.ne.s32.totalorder %s1249_s11, %s1245_s10 }
   0x7   : > { %p222_p1 = scmp.eq.s32.totalorder %s221_s17, 0  ;;  %p235_p2 = scmp.eq.s32.totalorder %s1332_s13, 1 }
   0x8   : > { %p240_p3 = scmp.ne.s32.totalorder %s1245_s10, %s1241_s30  ;;  %p241_p4 = scmp.eq.s32.totalorder %s1026_s14, 1 }
   0x9   : > { %s1347_s18 = scalar_select %p222_p1, %s1249_s11, %s224_s16  }
   0xa   : > { %p1349_p5 = por %p235_p2, %p234_p0  ;;  %p1353_p6 = por %p241_p4, %p240_p3 }
   0xb   : > { %p1027_p7 = scmp.ge.s32.totalorder %s1253_s12, 1  ;;  %p248_p8 = scmp.lt.s32.totalorder %s1253_s12, 3 }
   0xc   : > { %s1596_s20 = scalar_select %p1353_p6, 1, 0 }
   0xd   : > { %p1118_p9 = scmp.eq.s32.totalorder %s1332_s13, 0  ;;  %p1360_p10 = pnand %p1027_p7, %p248_p8 }
   0xe   : > { %s1255_s22 = smov [#allocation2]  }
   0xf   : > { %s272_s23 = sshll.u32 %s1255_s22, 4  ;;  %p1110_p11 = pneg %p1360_p10  ;;  %s273_s23 = int_to_ptr.vmem [resolvable:$true] %s272_s23 }
  0x10   : > { %s1174_s24 = scalar_lea.vmem %s273_s23, 8192  ;;  %p1182_p3 = scmp.lt.s32.totalorder %s273_s23, %s273_s23 }
  0x11   : > { %p1111_p12 = pnand %p1118_p9, %p1110_p11  ;;  %p1175_p0 = scmp.ne.s32.totalorder %s273_s23, %s1174_s24 }
  0x12   : > { %p1183_p4 = scmp.lt.s32.totalorder %s1174_s24, %s1174_s24 }
  0x13   : > { %p1165_p13 = pneg %p1111_p12 }
  0x14   : > { %p1184_p6 = por %p1183_p4, %p1182_p3 }
  0x15   : > { %p1177_p1 = pnand %p1175_p0, %p1165_p13 }
  0x17   : > { %p1178_p2 = pneg %p1177_p1 }
  0x19   : > { %p1185_p7 = pnand %p1184_p6, %p1178_p2 }
  0x1b   : > { %1188 = shalt.err (!%p1185_p7)
}
  0x1c   : > { %s1256_s25 = smov 256   ;;  %s1257_s26 = smov 16  }
  0x1d   : > { %1113 = dma.hbm_to_vmem [thread:$0]  (!%p1111_p12), %s1590_s5, 8192, %s273_s23, [#allocation3], %s1256_s25, %s1256_s25, %s1257_s26  }
  0x1e   : > { %304 = sbr.rel (%p1360_p10) target bundleno = 902 (0x386), region = 56 }
  0x23   : > { %1232 = dma.done.wait (%p1118_p9), [#allocation3], 8192  }
  0x24   : > { %1234 = vsyncadd (%p1118_p9), [#allocation3], 4294959104  ;;  %p339_p8 = scmp.lt.s32.totalorder %s1332_s13, 1  ;;  %v1258_v0 = vmov 0.0   ;;  %vm1259_vm0 = vmmov 0   ;;  %v347_v1 = vld [vmem:[%s1586_s1 + $0x18] sm:$0xff] }
  0x25   : > { %1088 = vmatprep.subr.mxu1 %v1258_v0  ;;  %1096 = vmatprep.mubr.msk.f32.mxu1 %vm1259_vm0, %v1258_v0  ;;  %v346_v2 = vld [vmem:[%s1586_s1 + $0x10] sm:$0xff]  ;;  %v345_v3 = vld [vmem:[%s1586_s1 + $0x8] sm:$0xff]  ;;  %v344_v4 = vld [vmem:[%s1586_s1] sm:$0xff]  ;;  %vm355_vm1 = vcmask 261120   ;;  %vm444_vm2 = vcmask 1043456   ;;  %vm440_vm3 = vcmask 31744  }
  0x26   : > { %s340_s29 = scalar_select %p339_p8, %s1332_s13, 1  ;;  %1089 = vmatpush3.msra.mxu1 %v347_v1  ;;  %v435_v6 = vld [vmem:[%s1593_s8] sm:$0xff]  ;;  %v716_v8 = vld [vmem:[#allocation2 + $0xf8] sm:$0xff]  ;;  %v715_v9 = vld [vmem:[#allocation2 + $0xf0] sm:$0xff] }
  0x27   : > { %1090 = vmatprep.subr.mxu1 %v1258_v0  ;;  %v439_v7 = vcombine.high %v435_v6, %v435_v6  ;;  %v714_v10 = vld [vmem:[#allocation2 + $0xe8] sm:$0xff]  ;;  %761 = vmatprep.subr.mxu0 %v716_v8  ;;  %v713_v11 = vld [vmem:[#allocation2 + $0xe0] sm:$0xff]  ;;  %v712_v12 = vld [vmem:[#allocation2 + $0xd8] sm:$0xff]  ;;  %s336_s24 = sand.u32 1, %s1245_s10   ;;  %s1043_s26 = sshll.u32 %s1332_s13, 7 }
  0x28   : > { %s1033_s14 = sshll.u32 %s340_s29, 3  ;;  %1091 = vmatpush3.msra.mxu1 %v346_v2  ;;  %762 = vmatpush1.msra.mxu0 %v715_v9  ;;  %v711_v13 = vld [vmem:[#allocation2 + $0xd0] sm:$0xff]  ;;  %v710_v14 = vld [vmem:[#allocation2 + $0xc8] sm:$0xff]  ;;  %v709_v15 = vld [vmem:[#allocation2 + $0xc0] sm:$0xff]  ;;  %s1032_s25 = sshll.u32 %s336_s24, 3 }
  0x29   : > { %s342_s27 = scalar_lea.vmem %s1585_s0, %s1033_s14  ;;  %1092 = vmatprep.subr.mxu1 %v1258_v0  ;;  %763 = vmatprep.subr.mxu0 %v714_v10  ;;  %v708_v16 = vld [vmem:[#allocation2 + $0xb8] sm:$0xff]  ;;  %v707_v17 = vld [vmem:[#allocation2 + $0xb0] sm:$0xff]  ;;  %v706_v18 = vld [vmem:[#allocation2 + $0xa8] sm:$0xff]  ;;  %s953_s16 = scalar_lea.hbm %s1594_s9, %s1043_s26 }
  0x2a   : > { %1093 = vmatpush3.msra.mxu1 %v345_v3  ;;  %v1399_v5 = vld [vmem:[%s342_s27] sm:$0xff]  ;;  %764 = vmatpush1.msra.mxu0 %v713_v11  ;;  %v704_v20 = vld [vmem:[#allocation2 + $0x98] sm:$0xff]  ;;  %v703_v21 = vld [vmem:[#allocation2 + $0x90] sm:$0xff]  ;;  %s338_s27 = scalar_lea.vmem [#allocation5], %s1032_s25  ;;  %s942_s17 = scalar_lea.sflag [#allocation4], %s336_s24 }
  0x2b   : > { %1094 = vmatprep.subr.mxu1 %v1258_v0  ;;  %765 = vmatprep.subr.mxu0 %v712_v12  ;;  %v705_v19 = vld [vmem:[#allocation2 + $0xa0] sm:$0xff]  ;;  %v702_v22 = vld [vmem:[#allocation2 + $0x88] sm:$0xff]  ;;  %v700_v24 = vld [vmem:[#allocation2 + $0x78] sm:$0xff]  ;;  %s955_s28 = sshll.u32 %s338_s27, 4  ;;  %s1260_s22 = smov [#allocation5]   ;;  %s956_s28 = int_to_ptr.vmem [resolvable:$true] %s955_s28 }
  0x2c   : > { %1095 = vmatpush3.msra.mxu1 %v344_v4  ;;  %766 = vmatpush1.msra.mxu0 %v711_v13  ;;  %v701_v23 = vld [vmem:[#allocation2 + $0x80] sm:$0xff]  ;;  %v699_v25 = vld [vmem:[#allocation2 + $0x70] sm:$0xff]  ;;  %v698_v26 = vld [vmem:[#allocation2 + $0x68] sm:$0xff]  ;;  %s1189_s21 = scalar_lea.vmem %s956_s28, 128  ;;  %s1193_s13 = sshll.u32 %s1260_s22, 4  ;;  %s1194_s13 = int_to_ptr.vmem [resolvable:$false] %s1193_s13 }
  0x2d   : > { %1097 = vmatmul.mubr.msk.f32.vlgmr.msra.gmra.mxu1 %vm355_vm1, %v1399_v5  ;;  %1036 = vmatprep.subr.msk.mxu1 %vm444_vm2, %v439_v7  ;;  %v697_v27 = vld [vmem:[#allocation2 + $0x60] sm:$0xff]  ;;  %v696_v28 = vld [vmem:[#allocation2 + $0x58] sm:$0xff]  ;;  %v695_v29 = vld [vmem:[#allocation2 + $0x50] sm:$0xff]  ;;  %p1190_p6 = scmp.ne.s32.totalorder %s956_s28, %s1189_s21  ;;  %s1195_s23 = scalar_lea.vmem %s1194_s13, 256 }
  0x2e   : > { %515 = vmatprep.mubr.f32.mxu1 %v1258_v0  ;;  %1037 = vmatpush1.msk.msra.mxu1 %vm444_vm2, %v435_v6  ;;  %v694_v30 = vld [vmem:[#allocation2 + $0x48] sm:$0xff]  ;;  %v693_v31 = vld [vmem:[#allocation2 + $0x40] sm:$0xff]  ;;  %v692_v32 = vld [vmem:[#allocation2 + $0x38] sm:$0xff]  ;;  %p1196_p11 = scmp.lt.s32.totalorder %s956_s28, %s1194_s13  ;;  %p1197_p12 = scmp.lt.s32.totalorder %s1195_s23, %s1189_s21 }
  0x2f   : > { %1099 = vmatprep.subr.mxu1 %v1258_v0  ;;  %767 = vmatprep.subr.mxu0 %v710_v14  ;;  %v691_v33 = vld [vmem:[#allocation2 + $0x30] sm:$0xff]  ;;  %v690_v34 = vld [vmem:[#allocation2 + $0x28] sm:$0xff]  ;;  %v689_v35 = vld [vmem:[#allocation2 + $0x20] sm:$0xff]  ;;  %p1191_p9 = pnand %p1190_p6, %p1349_p5 }
  0x30   : > { %768 = vmatpush1.msra.mxu0 %v709_v15  ;;  %v688_v36 = vld [vmem:[#allocation2 + $0x18] sm:$0xff]  ;;  %v687_v37 = vld [vmem:[#allocation2 + $0x10] sm:$0xff]  ;;  %v686_v38 = vld [vmem:[#allocation2 + $0x8] sm:$0xff]  ;;  %p1198_p13 = por %p1197_p12, %p1196_p11 }
  0x31   : > { %769 = vmatprep.subr.mxu0 %v708_v16  ;;  %v685_v39 = vld [vmem:[#allocation2] sm:$0xff]  ;;  %v748_v40 = vld [vmem:[#allocation2 + $0x1f8] sm:$0xff]  ;;  %v747_v41 = vld [vmem:[#allocation2 + $0x1f0] sm:$0xff]  ;;  %p1192_p10 = pneg %p1191_p9 }
  0x32   : > { %770 = vmatpush1.msra.mxu0 %v707_v17  ;;  %v746_v42 = vld [vmem:[#allocation2 + $0x1e8] sm:$0xff]  ;;  %v745_v43 = vld [vmem:[#allocation2 + $0x1e0] sm:$0xff]  ;;  %v744_v44 = vld [vmem:[#allocation2 + $0x1d8] sm:$0xff] }
  0x33   : > { %771 = vmatprep.subr.mxu0 %v706_v18  ;;  %v743_v45 = vld [vmem:[#allocation2 + $0x1d0] sm:$0xff]  ;;  %v742_v46 = vld [vmem:[#allocation2 + $0x1c8] sm:$0xff]  ;;  %v741_v47 = vld [vmem:[#allocation2 + $0x1c0] sm:$0xff]  ;;  %p1199_p0 = pnand %p1198_p13, %p1192_p10 }
  0x34   : > { %772 = vmatpush1.msra.mxu0 %v705_v19  ;;  %v740_v48 = vld [vmem:[#allocation2 + $0x1b8] sm:$0xff]  ;;  %v739_v49 = vld [vmem:[#allocation2 + $0x1b0] sm:$0xff]  ;;  %v738_v50 = vld [vmem:[#allocation2 + $0x1a8] sm:$0xff] }
  0x35   : > { %773 = vmatprep.subr.mxu0 %v704_v20  ;;  %v737_v51 = vld [vmem:[#allocation2 + $0x1a0] sm:$0xff]  ;;  %v736_v52 = vld [vmem:[#allocation2 + $0x198] sm:$0xff]  ;;  %v436_v61 = vld [vmem:[%s1593_s8 + $0x8] sm:$0xf] }
  0x36   : > { %774 = vmatpush1.msra.mxu0 %v703_v21  ;;  %v1034_v53 = vld [vmem:[%s1587_s2] ss:$0 sm:$0xff]  ;;  %v599_v63 = vld [vmem:[%s1588_s3 + $0x38] sm:$0xff]  ;;  %v598_v1 = vld [vmem:[%s1588_s3 + $0x30] sm:$0xff] }
  0x37   : > { %775 = vmatprep.subr.mxu0 %v702_v22  ;;  %v597_v2 = vld [vmem:[%s1588_s3 + $0x28] sm:$0xff]  ;;  %v596_v3 = vld [vmem:[%s1588_s3 + $0x20] sm:$0xff]  ;;  %v595_v4 = vld [vmem:[%s1588_s3 + $0x18] sm:$0xff] }
  0x38   : > { %776 = vmatpush1.msra.mxu0 %v701_v23  ;;  %v594_v6 = vld [vmem:[%s1588_s3 + $0x10] sm:$0xff]  ;;  %v593_v7 = vld [vmem:[%s1588_s3 + $0x8] sm:$0xff]  ;;  %v592_v8 = vld [vmem:[%s1588_s3] sm:$0xff] }
  0x39   : > { %777 = vmatprep.subr.mxu0 %v700_v24  ;;  %v734_v9 = vld [vmem:[#allocation2 + $0x188] sm:$0xff]  ;;  %v733_v10 = vld [vmem:[#allocation2 + $0x180] sm:$0xff]  ;;  %v732_v11 = vld [vmem:[#allocation2 + $0x178] sm:$0xff] }
  0x3a   : > { %778 = vmatpush1.msra.mxu0 %v699_v25  ;;  %v731_v12 = vld [vmem:[#allocation2 + $0x170] sm:$0xff]  ;;  %v730_v13 = vld [vmem:[#allocation2 + $0x168] sm:$0xff]  ;;  %v729_v14 = vld [vmem:[#allocation2 + $0x160] sm:$0xff] }
  0x3b   : > { %779 = vmatprep.subr.mxu0 %v698_v26  ;;  %v728_v15 = vld [vmem:[#allocation2 + $0x158] sm:$0xff]  ;;  %v727_v16 = vld [vmem:[#allocation2 + $0x150] sm:$0xff]  ;;  %v726_v17 = vld [vmem:[#allocation2 + $0x148] sm:$0xff] }
  0x3c   : > { %780 = vmatpush1.msra.mxu0 %v697_v27  ;;  %v725_v18 = vld [vmem:[#allocation2 + $0x140] sm:$0xff]  ;;  %v724_v19 = vld [vmem:[#allocation2 + $0x138] sm:$0xff]  ;;  %v723_v20 = vld [vmem:[#allocation2 + $0x130] sm:$0xff] }
  0x3d   : > { %781 = vmatprep.subr.mxu0 %v696_v28  ;;  %v722_v21 = vld [vmem:[#allocation2 + $0x128] sm:$0xff]  ;;  %v721_v22 = vld [vmem:[#allocation2 + $0x120] sm:$0xff]  ;;  %v720_v23 = vld [vmem:[#allocation2 + $0x118] sm:$0xff] }
  0x3e   : > { %782 = vmatpush1.msra.mxu0 %v695_v29  ;;  %v719_v24 = vld [vmem:[#allocation2 + $0x110] sm:$0xff]  ;;  %v718_v25 = vld [vmem:[#allocation2 + $0x108] sm:$0xff]  ;;  %v717_v26 = vld [vmem:[#allocation2 + $0x100] sm:$0xff] }
  0x3f   : > { %783 = vmatprep.subr.mxu0 %v694_v30  ;;  %v867_v27 = vld [vmem:[%s1592_s7 + $0xf8] sm:$0xff]  ;;  %v866_v29 = vld [vmem:[%s1592_s7 + $0xf0] sm:$0xff] }
  0x40   : > { %784 = vmatpush1.msra.mxu0 %v693_v31  ;;  %v851_v28 = vld [vmem:[%s1592_s7 + $0x78] sm:$0xff]  ;;  %v850_v30 = vld [vmem:[%s1592_s7 + $0x70] sm:$0xff]  ;;  %v865_v31 = vld [vmem:[%s1592_s7 + $0xe8] sm:$0xff] }
  0x41   : > { %785 = vmatprep.subr.mxu0 %v692_v32  ;;  %v849_v32 = vld [vmem:[%s1592_s7 + $0x68] sm:$0xff] }
  0x42   : > { %786 = vmatpush1.msra.mxu0 %v691_v33  ;;  %v864_v33 = vld [vmem:[%s1592_s7 + $0xe0] sm:$0xff] }
  0x43   : > { %787 = vmatprep.subr.mxu0 %v690_v34  ;;  %v848_v34 = vld [vmem:[%s1592_s7 + $0x60] sm:$0xff] }
  0x44   : > { %788 = vmatpush1.msra.mxu0 %v689_v35  ;;  %v863_v35 = vld [vmem:[%s1592_s7 + $0xd8] sm:$0xff] }
  0x45   : > { %789 = vmatprep.subr.mxu0 %v688_v36  ;;  %v847_v36 = vld [vmem:[%s1592_s7 + $0x58] sm:$0xff] }
  0x46   : > { %790 = vmatpush1.msra.mxu0 %v687_v37  ;;  %v862_v37 = vld [vmem:[%s1592_s7 + $0xd0] sm:$0xff] }
  0x47   : > { %791 = vmatprep.subr.mxu0 %v686_v38  ;;  %v846_v38 = vld [vmem:[%s1592_s7 + $0x50] sm:$0xff] }
  0x48   : > { %792 = vmatpush1.msra.mxu0 %v685_v39  ;;  %v861_v39 = vld [vmem:[%s1592_s7 + $0xc8] sm:$0xff] }
  0x49   : > { %793 = vmatprep.subr.mxu0 %v748_v40  ;;  %v845_v40 = vld [vmem:[%s1592_s7 + $0x48] sm:$0xff] }
  0x4a   : > { %794 = vmatpush2.msra.mxu0 %v747_v41  ;;  %v860_v41 = vld [vmem:[%s1592_s7 + $0xc0] sm:$0xff] }
  0x4b   : > { %795 = vmatprep.subr.mxu0 %v746_v42  ;;  %v844_v42 = vld [vmem:[%s1592_s7 + $0x40] sm:$0xff] }
  0x4c   : > { %796 = vmatpush2.msra.mxu0 %v745_v43  ;;  %v859_v43 = vld [vmem:[%s1592_s7 + $0xb8] sm:$0xff] }
  0x4d   : > { %797 = vmatprep.subr.mxu0 %v744_v44  ;;  %v843_v44 = vld [vmem:[%s1592_s7 + $0x38] sm:$0xff] }
  0x4e   : > { %798 = vmatpush2.msra.mxu0 %v743_v45  ;;  %v858_v45 = vld [vmem:[%s1592_s7 + $0xb0] sm:$0xff] }
  0x4f   : > { %799 = vmatprep.subr.mxu0 %v742_v46  ;;  %v842_v46 = vld [vmem:[%s1592_s7 + $0x30] sm:$0xff] }
  0x50   : > { %800 = vmatpush2.msra.mxu0 %v741_v47  ;;  %v857_v47 = vld [vmem:[%s1592_s7 + $0xa8] sm:$0xff] }
  0x51   : > { %801 = vmatprep.subr.mxu0 %v740_v48  ;;  %v841_v48 = vld [vmem:[%s1592_s7 + $0x28] sm:$0xff] }
  0x52   : > { %802 = vmatpush2.msra.mxu0 %v739_v49  ;;  %v602_v49 = vlaneseq }
  0x53   : > { %803 = vmatprep.subr.mxu0 %v738_v50 }
  0x54   : > { %804 = vmatpush2.msra.mxu0 %v737_v51 }
  0x55   : > { %805 = vmatprep.subr.mxu0 %v736_v52  ;;  %v603_v52 = vshrl.u32 %v602_v49, 7 }
  0xed   : > { %v425_v54 = vpop.f32.mrf.mxu1 }
  0xee   : > { %v426_v55 = vadd.f32 %v1034_v53, %v425_v54 }
  0xef   : > { %v1098_v56 = vpop.f32.mrf.mxu1 }
  0xf0   : > { %v429_v57 = vsub.f32 0.0, %v426_v55  ;;  %v604_v55 = vsub.s32 0, %v603_v52  ;;  %v600_v56 = vld [vmem:[%s1589_s4] sm:$0x3] }
  0xf2   : > { %v430_v58 = vmul.f32 1.442695, %v429_v57  ;;  %v608_v57 = vsub.s32 1, %v603_v52 }
  0xf4   : > { %1159 = vpow2.f32 %v430_v58  ;;  %v605_v58 = vrot.slane %v600_v56, %v604_v55 }
 0x101   : > { %v1160_v59 = vpop.eup %1159 }
 0x102   : > { %v432_v60 = vadd.f32 1.0, %v1160_v59  ;;  %v609_v59 = vrot.slane %v600_v56, %v608_v57 }
 0x104   : > { %1161 = vrcp.f32 %v432_v60 }
 0x111   : > { %v1162_v62 = vpop.eup %1161 }
 0x112   : > { %1038 = vmatmul.mubr.msk.f32.vlgmr.msra.gmra.mxu1 %vm440_vm3, %v1162_v62 }
 0x113   : > { %1100 = vmatpush3.msk.msra.mxu1 %vm444_vm2, %v436_v61  ;;  %1101 = vmatprep.mubr.msk.f32.mxu1 %vm1259_vm0, %v1258_v0 }
 0x114   : > { %636 = vmatprep.subr.mxu1 %v599_v63 }
 0x116   : > { %1102 = vmatmul.mubr.msk.f32.vlgmr.msra.gmra.mxu1 %vm440_vm3, %v1162_v62 }
 0x117   : > { %637 = vmatpush1.msra.mxu1 %v598_v1  ;;  %676 = vmatprep.mubr.f32.mxu1 %v1258_v0  ;;  %v735_v0 = vld [vmem:[#allocation2 + $0x190] sm:$0xff] }
 0x118   : > { %638 = vmatprep.subr.mxu1 %v597_v2  ;;  %806 = vmatpush2.msra.mxu0 %v735_v0  ;;  %v838_v0 = vld [vmem:[%s1592_s7 + $0x10] sm:$0xff] }
 0x119   : > { %639 = vmatpush1.msra.mxu1 %v596_v3  ;;  %807 = vmatprep.subr.mxu0 %v734_v9  ;;  %v856_v3 = vld [vmem:[%s1592_s7 + $0xa0] sm:$0xff]  ;;  %v853_v9 = vld [vmem:[%s1592_s7 + $0x88] sm:$0xff] }
 0x11a   : > { %640 = vmatprep.subr.mxu1 %v595_v4  ;;  %808 = vmatpush2.msra.mxu0 %v733_v10  ;;  %v840_v4 = vld [vmem:[%s1592_s7 + $0x20] sm:$0xff]  ;;  %v837_v10 = vld [vmem:[%s1592_s7 + $0x8] sm:$0xff] }
 0x11b   : > { %641 = vmatpush1.msra.mxu1 %v594_v6  ;;  %809 = vmatprep.subr.mxu0 %v732_v11  ;;  %v855_v6 = vld [vmem:[%s1592_s7 + $0x98] sm:$0xff]  ;;  %v852_v11 = vld [vmem:[%s1592_s7 + $0x80] sm:$0xff] }
 0x11c   : > { %642 = vmatprep.subr.mxu1 %v593_v7  ;;  %810 = vmatpush2.msra.mxu0 %v731_v12  ;;  %v839_v7 = vld [vmem:[%s1592_s7 + $0x18] sm:$0xff]  ;;  %v836_v12 = vld [vmem:[%s1592_s7] sm:$0xff] }
 0x11d   : > { %643 = vmatpush1.msra.mxu1 %v592_v8  ;;  %811 = vmatprep.subr.mxu0 %v730_v13  ;;  %v854_v8 = vld [vmem:[%s1592_s7 + $0x90] sm:$0xff]  ;;  %v749_v13 = vld [vmem:[%s1591_s6] sm:$0x3] }
 0x11e   : > { %1041 = vmatmul.mubr.msk.f32.vlgmr.msra.gmra.mxu1 %vm355_vm1, %v1399_v5  ;;  %812 = vmatpush2.msra.mxu0 %v729_v14  ;;  %v754_v14 = vrot.slane %v749_v13, %v604_v55 }
 0x11f   : > { %813 = vmatprep.subr.mxu0 %v728_v15  ;;  %1053 = vmatprep.subr.mxu1 %v867_v27  ;;  %v758_v15 = vrot.slane %v749_v13, %v608_v57 }
 0x120   : > { %814 = vmatpush2.msra.mxu0 %v727_v16  ;;  %1054 = vmatpush3.msra.mxu1 %v851_v28 }
 0x121   : > { %815 = vmatprep.subr.mxu0 %v726_v17  ;;  %1055 = vmatprep.subr.mxu1 %v866_v29 }
 0x122   : > { %816 = vmatpush2.msra.mxu0 %v725_v18  ;;  %1056 = vmatpush3.msra.mxu1 %v850_v30 }
 0x123   : > { %817 = vmatprep.subr.mxu0 %v724_v19  ;;  %1057 = vmatprep.subr.mxu1 %v865_v31 }
 0x124   : > { %818 = vmatpush2.msra.mxu0 %v723_v20  ;;  %1058 = vmatpush3.msra.mxu1 %v849_v32 }
 0x125   : > { %819 = vmatprep.subr.mxu0 %v722_v21  ;;  %1059 = vmatprep.subr.mxu1 %v864_v33 }
 0x126   : > { %820 = vmatpush2.msra.mxu0 %v721_v22  ;;  %1060 = vmatpush3.msra.mxu1 %v848_v34 }
 0x127   : > { %821 = vmatprep.subr.mxu0 %v720_v23  ;;  %1061 = vmatprep.subr.mxu1 %v863_v35 }
 0x128   : > { %822 = vmatpush2.msra.mxu0 %v719_v24  ;;  %1062 = vmatpush3.msra.mxu1 %v847_v36 }
 0x129   : > { %823 = vmatprep.subr.mxu0 %v718_v25  ;;  %1063 = vmatprep.subr.mxu1 %v862_v37 }
 0x12a   : > { %824 = vmatpush2.msra.mxu0 %v717_v26  ;;  %1064 = vmatpush3.msra.mxu1 %v846_v38 }
 0x12b   : > { %1065 = vmatprep.subr.mxu1 %v861_v39 }
 0x12c   : > { %1066 = vmatpush3.msra.mxu1 %v845_v40 }
 0x12d   : > { %1067 = vmatprep.subr.mxu1 %v860_v41 }
 0x12e   : > { %1068 = vmatpush3.msra.mxu1 %v844_v42 }
 0x12f   : > { %1069 = vmatprep.subr.mxu1 %v859_v43 }
 0x130   : > { %1070 = vmatpush3.msra.mxu1 %v843_v44 }
 0x131   : > { %1071 = vmatprep.subr.mxu1 %v858_v45 }
 0x132   : > { %1072 = vmatpush3.msra.mxu1 %v842_v46 }
 0x133   : > { %1073 = vmatprep.subr.mxu1 %v857_v47 }
 0x134   : > { %1074 = vmatpush3.msra.mxu1 %v841_v48 }
 0x135   : > { %1075 = vmatprep.subr.mxu1 %v856_v3 }
 0x136   : > { %1076 = vmatpush3.msra.mxu1 %v840_v4 }
 0x137   : > { %1077 = vmatprep.subr.mxu1 %v855_v6 }
 0x138   : > { %1078 = vmatpush3.msra.mxu1 %v839_v7 }
 0x139   : > { %1079 = vmatprep.subr.mxu1 %v854_v8 }
 0x13a   : > { %1080 = vmatpush3.msra.mxu1 %v838_v0 }
 0x13b   : > { %1081 = vmatprep.subr.mxu1 %v853_v9 }
 0x13c   : > { %1082 = vmatpush3.msra.mxu1 %v837_v10 }
 0x13d   : > { %1083 = vmatprep.subr.mxu1 %v852_v11 }
 0x13e   : > { %1084 = vmatpush3.msra.mxu1 %v836_v12 }
 0x1d2   : > { %v517_v50 = vpop.f32.mrf.mxu1 }
 0x1d4   : > { %v519_v51 = vpop.f32.mrf.mxu1 }
 0x1d6   : > { %v588_v53 = vpop.f32.mrf.mxu1 }
 0x1d8   : > { %v1103_v54 = vpop.f32.mrf.mxu1 }
 0x1de   : > { %v678_v60 = vpop.f32.mrf.mxu1 }
 0x1df   : > { %v679_v61 = vadd.f32 %v678_v60, %v605_v58 }
 0x1e0   : > { %v680_v62 = vpop.f32.mrf.mxu1 }
 0x1e1   : > { %v681_v63 = vadd.f32 %v680_v62, %v609_v59  ;;  %v683_v2 = vmax.f32 %v679_v61, 0.0 }
 0x1e3   : > { %v684_v1 = vmax.f32 %v681_v63, 0.0 }
 0x1e5   : > { %825 = vmatprep.mubr.f32.mxu0 %v684_v1 }
 0x1e6   : > { %826 = vmatmul.mubr.f32.vlgmr.msra.gmra.mxu0 %v683_v2 }
 0x2a6   : > { %v827_v16 = vpop.f32.mrf.mxu0 }
 0x2a7   : > { %v828_v17 = vadd.f32 %v827_v16, %v754_v14 }
 0x2a8   : > { %v829_v18 = vpop.f32.mrf.mxu0 }
 0x2a9   : > { %v830_v19 = vadd.f32 %v829_v18, %v758_v15  ;;  %v832_v20 = vmax.f32 %v828_v17, 0.0 }
 0x2ab   : > { %v833_v21 = vmax.f32 %v830_v19, 0.0  ;;  %v834_v23 = vmul.f32 %v832_v20, %v517_v50 }
 0x2ad   : > { %v835_v22 = vmul.f32 %v833_v21, %v519_v51 }
 0x2af   : > { %932 = vmatprep.mubr.f32.mxu1 %v835_v22 }
 0x2b0   : > { %933 = vmatmul.mubr.f32.vlgmr.msra.gmra.mxu1 %v834_v23 }
 0x370   : > { %v1085_v24 = vpop.f32.mrf.mxu1 }
 0x372   : > { %v1086_v25 = vpop.f32.mrf.mxu1 }
 0x373   : > { %v1087_v26 = vadd.f32 %v1086_v25, %v1085_v24 }
 0x375   : > { %v938_v27 = vadd.f32 %v1087_v26, %v1399_v5 }
 0x377   : > { %v939_v28 = vadd.f32 %v938_v27, %v588_v53 }
 0x379   : > { %940 = vst.msk [vmem:[%s338_s27] sm:$0xff] %vm355_vm1, %v939_v28 }
 0x37a   : > { %1202 = shalt.err (!%p1199_p0)
}
 0x37b   : > { %s1203_s25 = scalar_lea.hbm %s953_s16, 128  ;;  %s1207_s27 = scalar_lea.hbm %s1594_s9, 256 }
 0x37c   : > { %p1204_p1 = scmp.ne.s32.totalorder %s953_s16, %s1203_s25  ;;  %p1208_p4 = scmp.lt.s32.totalorder %s953_s16, %s1594_s9 }
 0x37d   : > { %p1209_p7 = scmp.lt.s32.totalorder %s1207_s27, %s1203_s25 }
 0x37e   : > { %p1205_p2 = pnand %p1204_p1, %p1349_p5 }
 0x37f   : > { %p1210_p8 = por %p1209_p7, %p1208_p4 }
 0x380   : > { %p1206_p3 = pneg %p1205_p2 }
 0x382   : > { %p1211_p6 = pnand %p1210_p8, %p1206_p3 }
 0x384   : > { %1214 = shalt.err (!%p1211_p6)
}
 0x385   : > { %1108 = dma.vmem_to_hbm [thread:$0]  (%p1349_p5), %s956_s28, 128, %s953_s16, %s942_s17  }
 0x386 PF: > { %p1120_p9 = scmp.ge.s32.totalorder %s1253_s12, 2  ;;  %s967_s21 = sand.u32 1, %s1241_s30  }
 0x387   : > { %p1598_p10 = scmp.ne.s32.totalorder %s1596_s20, 0  ;;  %s968_s22 = scalar_lea.sflag [#allocation4], %s967_s21 }
 0x389   : > { %p1115_p11 = pnand %p1120_p9, %p1598_p10 }
 0x38b   : > { %p1116_p12 = pneg %p1115_p11 }
 0x38d   : > { %1236 = dma.done.wait (%p1116_p12), %s968_s22, 128  }
 0x38e   : > { %1238 = vsyncadd (%p1116_p12), %s968_s22, 4294967168  ;;  %p20_p13 = scmp.ge.s32.totalorder %s1336_s15, 4   ;;  %s1599_s30 = smov %s1245_s10 }
 0x38f   : > { %s1600_s10 = smov %s1249_s11  ;;  %s1601_s11 = smov %s1347_s18 }
 0x390   : > { %s1602_s12 = smov %s1336_s15  ;;  %22 = sbr.rel (!%p20_p13) target bundleno = 4 (0x4), region = 96 }
 0x395   :  { %973 = vsyncpa [#allocation3], 1 }
 0x396   :  { %975 = vsyncpa [#allocation3 + $0x1], 1 }
 0x397   :  { %976 = vsyncpa [#allocation4], 1 }
 0x398   :  { %978 = vsyncpa [#allocation4 + $0x1], 1 }

// kernel: tpu_custom_call.1
= control target key start
LH: loop header
LB: loop body
LE: loop exit
PB: predicated region body
PF: predicated region fallthrough
CT: control target
= control target key end

     0   :  { %14 = vsyncpa [#allocation3], 0  ;;  %s1585_s0 = inlined_call_operand.vmem [shape: f32[16,32], index: 0, kind: input, shape index: {}]   ;;  %s1586_s1 = inlined_call_operand.vmem [shape: f32[32,4], index: 1, kind: input, shape index: {}]   ;;  %s1587_s2 = inlined_call_operand.vmem [shape: f32[1,4], index: 2, kind: input, shape index: {}]   ;;  %s1588_s3 = inlined_call_operand.vmem [shape: f32[32,256], index: 3, kind: input, shape index: {}]   ;;  %s1589_s4 = inlined_call_operand.vmem [shape: f32[1,256], index: 4, kind: input, shape index: {}]   ;;  %s1590_s5 = inlined_call_operand.hbm [shape: f32[256,256], index: 5, kind: input, shape index: {}]   ;;  %s1591_s6 = inlined_call_operand.vmem [shape: f32[1,256], index: 6, kind: input, shape index: {}]   ;;  %s1592_s7 = inlined_call_operand.vmem [shape: f32[256,32], index: 7, kind: input, shape index: {}]   ;;  %s1593_s8 = inlined_call_operand.vmem [shape: f32[4,288], index: 8, kind: input, shape index: {}]   ;;  %s1594_s9 = inlined_call_operand.hbm [shape: f32[16,32], index: 9, kind: output, shape index: {}]  }
   0x1   :  { %15 = vsyncpa [#allocation4], 0 }
   0x2   :  { %17 = vsyncpa [#allocation4 + $0x1], 0  ;;  %s1311_s30 = smov 0   ;;  %s1313_s10 = smov 0  }
   0x3   :  { %s1315_s11 = smov 0   ;;  %s1317_s12 = smov 0  }
   0x4 LB: > { %s1332_s13 = sadd.s32 4294967295, %s1253_s12   ;;  %s1026_s14 = sadd.s32 4294967294, %s1253_s12   ;;  %s1253_s12 = sphi %s1317_s12, %s1602_s12   ;;  %s1249_s11 = sphi %s1315_s11, %s1601_s11   ;;  %s1245_s10 = sphi %s1313_s10, %s1600_s10   ;;  %s1241_s30 = sphi %s1311_s30, %s1599_s30  }
   0x5   : > { %s1336_s15 = sadd.s32 1, %s1253_s12   ;;  %s224_s16 = sadd.s32 1, %s1249_s11 }
   0x6   : > { %s221_s17 = ssub.s32 %s1253_s12, %s1336_s15  ;;  %p234_p0 = scmp.ne.s32.totalorder %s1249_s11, %s1245_s10 }
   0x7   : > { %p222_p1 = scmp.eq.s32.totalorder %s221_s17, 0  ;;  %p235_p2 = scmp.eq.s32.totalorder %s1332_s13, 1 }
   0x8   : > { %p240_p3 = scmp.ne.s32.totalorder %s1245_s10, %s1241_s30  ;;  %p241_p4 = scmp.eq.s32.totalorder %s1026_s14, 1 }
   0x9   : > { %s1347_s18 = scalar_select %p222_p1, %s1249_s11, %s224_s16  }
   0xa   : > { %p1349_p5 = por %p235_p2, %p234_p0  ;;  %p1353_p6 = por %p241_p4, %p240_p3 }
   0xb   : > { %p1027_p7 = scmp.ge.s32.totalorder %s1253_s12, 1  ;;  %p248_p8 = scmp.lt.s32.totalorder %s1253_s12, 3 }
   0xc   : > { %s1596_s20 = scalar_select %p1353_p6, 1, 0 }
   0xd   : > { %p1118_p9 = scmp.eq.s32.totalorder %s1332_s13, 0  ;;  %p1360_p10 = pnand %p1027_p7, %p248_p8 }
   0xe   : > { %s1255_s22 = smov [#allocation2]  }
   0xf   : > { %s272_s23 = sshll.u32 %s1255_s22, 4  ;;  %p1110_p11 = pneg %p1360_p10  ;;  %s273_s23 = int_to_ptr.vmem [resolvable:$true] %s272_s23 }
  0x10   : > { %s1174_s24 = scalar_lea.vmem %s273_s23, 8192  ;;  %p1182_p3 = scmp.lt.s32.totalorder %s273_s23, %s273_s23 }
  0x11   : > { %p1111_p12 = pnand %p1118_p9, %p1110_p11  ;;  %p1175_p0 = scmp.ne.s32.totalorder %s273_s23, %s1174_s24 }
  0x12   : > { %p1183_p4 = scmp.lt.s32.totalorder %s1174_s24, %s1174_s24 }
  0x13   : > { %p1165_p13 = pneg %p1111_p12 }
  0x14   : > { %p1184_p6 = por %p1183_p4, %p1182_p3 }
  0x15   : > { %p1177_p1 = pnand %p1175_p0, %p1165_p13 }
  0x17   : > { %p1178_p2 = pneg %p1177_p1 }
  0x19   : > { %p1185_p7 = pnand %p1184_p6, %p1178_p2 }
  0x1b   : > { %1188 = shalt.err (!%p1185_p7)
}
  0x1c   : > { %s1256_s25 = smov 256   ;;  %s1257_s26 = smov 16  }
  0x1d   : > { %1113 = dma.hbm_to_vmem [thread:$0]  (!%p1111_p12), %s1590_s5, 8192, %s273_s23, [#allocation3], %s1256_s25, %s1256_s25, %s1257_s26  }
  0x1e   : > { %304 = sbr.rel (%p1360_p10) target bundleno = 902 (0x386), region = 56 }
  0x23   : > { %1232 = dma.done.wait (%p1118_p9), [#allocation3], 8192  }
  0x24   : > { %1234 = vsyncadd (%p1118_p9), [#allocation3], 4294959104  ;;  %p339_p8 = scmp.lt.s32.totalorder %s1332_s13, 1  ;;  %v1258_v0 = vmov 0.0   ;;  %vm1259_vm0 = vmmov 0   ;;  %v347_v1 = vld [vmem:[%s1586_s1 + $0x18] sm:$0xff] }
  0x25   : > { %1088 = vmatprep.subr.mxu1 %v1258_v0  ;;  %1096 = vmatprep.mubr.msk.f32.mxu1 %vm1259_vm0, %v1258_v0  ;;  %v346_v2 = vld [vmem:[%s1586_s1 + $0x10] sm:$0xff]  ;;  %v345_v3 = vld [vmem:[%s1586_s1 + $0x8] sm:$0xff]  ;;  %v344_v4 = vld [vmem:[%s1586_s1] sm:$0xff]  ;;  %vm355_vm1 = vcmask 261120   ;;  %vm444_vm2 = vcmask 1043456   ;;  %vm440_vm3 = vcmask 31744  }
  0x26   : > { %s340_s29 = scalar_select %p339_p8, %s1332_s13, 1  ;;  %1089 = vmatpush3.msra.mxu1 %v347_v1  ;;  %v435_v6 = vld [vmem:[%s1593_s8] sm:$0xff]  ;;  %v716_v8 = vld [vmem:[#allocation2 + $0xf8] sm:$0xff]  ;;  %v715_v9 = vld [vmem:[#allocation2 + $0xf0] sm:$0xff] }
  0x27   : > { %1090 = vmatprep.subr.mxu1 %v1258_v0  ;;  %v439_v7 = vcombine.high %v435_v6, %v435_v6  ;;  %v714_v10 = vld [vmem:[#allocation2 + $0xe8] sm:$0xff]  ;;  %761 = vmatprep.subr.mxu0 %v716_v8  ;;  %v713_v11 = vld [vmem:[#allocation2 + $0xe0] sm:$0xff]  ;;  %v712_v12 = vld [vmem:[#allocation2 + $0xd8] sm:$0xff]  ;;  %s336_s24 = sand.u32 1, %s1245_s10   ;;  %s1043_s26 = sshll.u32 %s1332_s13, 7 }
  0x28   : > { %s1033_s14 = sshll.u32 %s340_s29, 3  ;;  %1091 = vmatpush3.msra.mxu1 %v346_v2  ;;  %762 = vmatpush1.msra.mxu0 %v715_v9  ;;  %v711_v13 = vld [vmem:[#allocation2 + $0xd0] sm:$0xff]  ;;  %v710_v14 = vld [vmem:[#allocation2 + $0xc8] sm:$0xff]  ;;  %v709_v15 = vld [vmem:[#allocation2 + $0xc0] sm:$0xff]  ;;  %s1032_s25 = sshll.u32 %s336_s24, 3 }
  0x29   : > { %s342_s27 = scalar_lea.vmem %s1585_s0, %s1033_s14  ;;  %1092 = vmatprep.subr.mxu1 %v1258_v0  ;;  %763 = vmatprep.subr.mxu0 %v714_v10  ;;  %v708_v16 = vld [vmem:[#allocation2 + $0xb8] sm:$0xff]  ;;  %v707_v17 = vld [vmem:[#allocation2 + $0xb0] sm:$0xff]  ;;  %v706_v18 = vld [vmem:[#allocation2 + $0xa8] sm:$0xff]  ;;  %s953_s16 = scalar_lea.hbm %s1594_s9, %s1043_s26 }
  0x2a   : > { %1093 = vmatpush3.msra.mxu1 %v345_v3  ;;  %v1399_v5 = vld [vmem:[%s342_s27] sm:$0xff]  ;;  %764 = vmatpush1.msra.mxu0 %v713_v11  ;;  %v704_v20 = vld [vmem:[#allocation2 + $0x98] sm:$0xff]  ;;  %v703_v21 = vld [vmem:[#allocation2 + $0x90] sm:$0xff]  ;;  %s338_s27 = scalar_lea.vmem [#allocation5], %s1032_s25  ;;  %s942_s17 = scalar_lea.sflag [#allocation4], %s336_s24 }
  0x2b   : > { %1094 = vmatprep.subr.mxu1 %v1258_v0  ;;  %765 = vmatprep.subr.mxu0 %v712_v12  ;;  %v705_v19 = vld [vmem:[#allocation2 + $0xa0] sm:$0xff]  ;;  %v702_v22 = vld [vmem:[#allocation2 + $0x88] sm:$0xff]  ;;  %v700_v24 = vld [vmem:[#allocation2 + $0x78] sm:$0xff]  ;;  %s955_s28 = sshll.u32 %s338_s27, 4  ;;  %s1260_s22 = smov [#allocation5]   ;;  %s956_s28 = int_to_ptr.vmem [resolvable:$true] %s955_s28 }
  0x2c   : > { %1095 = vmatpush3.msra.mxu1 %v344_v4  ;;  %766 = vmatpush1.msra.mxu0 %v711_v13  ;;  %v701_v23 = vld [vmem:[#allocation2 + $0x80] sm:$0xff]  ;;  %v699_v25 = vld [vmem:[#allocation2 + $0x70] sm:$0xff]  ;;  %v698_v26 = vld [vmem:[#allocation2 + $0x68] sm:$0xff]  ;;  %s1189_s21 = scalar_lea.vmem %s956_s28, 128  ;;  %s1193_s13 = sshll.u32 %s1260_s22, 4  ;;  %s1194_s13 = int_to_ptr.vmem [resolvable:$false] %s1193_s13 }
  0x2d   : > { %1097 = vmatmul.mubr.msk.f32.vlgmr.msra.gmra.mxu1 %vm355_vm1, %v1399_v5  ;;  %1036 = vmatprep.subr.msk.mxu1 %vm444_vm2, %v439_v7  ;;  %v697_v27 = vld [vmem:[#allocation2 + $0x60] sm:$0xff]  ;;  %v696_v28 = vld [vmem:[#allocation2 + $0x58] sm:$0xff]  ;;  %v695_v29 = vld [vmem:[#allocation2 + $0x50] sm:$0xff]  ;;  %p1190_p6 = scmp.ne.s32.totalorder %s956_s28, %s1189_s21  ;;  %s1195_s23 = scalar_lea.vmem %s1194_s13, 256 }
  0x2e   : > { %515 = vmatprep.mubr.f32.mxu1 %v1258_v0  ;;  %1037 = vmatpush1.msk.msra.mxu1 %vm444_vm2, %v435_v6  ;;  %v694_v30 = vld [vmem:[#allocation2 + $0x48] sm:$0xff]  ;;  %v693_v31 = vld [vmem:[#allocation2 + $0x40] sm:$0xff]  ;;  %v692_v32 = vld [vmem:[#allocation2 + $0x38] sm:$0xff]  ;;  %p1196_p11 = scmp.lt.s32.totalorder %s956_s28, %s1194_s13  ;;  %p1197_p12 = scmp.lt.s32.totalorder %s1195_s23, %s1189_s21 }
  0x2f   : > { %1099 = vmatprep.subr.mxu1 %v1258_v0  ;;  %767 = vmatprep.subr.mxu0 %v710_v14  ;;  %v691_v33 = vld [vmem:[#allocation2 + $0x30] sm:$0xff]  ;;  %v690_v34 = vld [vmem:[#allocation2 + $0x28] sm:$0xff]  ;;  %v689_v35 = vld [vmem:[#allocation2 + $0x20] sm:$0xff]  ;;  %p1191_p9 = pnand %p1190_p6, %p1349_p5 }
  0x30   : > { %768 = vmatpush1.msra.mxu0 %v709_v15  ;;  %v688_v36 = vld [vmem:[#allocation2 + $0x18] sm:$0xff]  ;;  %v687_v37 = vld [vmem:[#allocation2 + $0x10] sm:$0xff]  ;;  %v686_v38 = vld [vmem:[#allocation2 + $0x8] sm:$0xff]  ;;  %p1198_p13 = por %p1197_p12, %p1196_p11 }
  0x31   : > { %769 = vmatprep.subr.mxu0 %v708_v16  ;;  %v685_v39 = vld [vmem:[#allocation2] sm:$0xff]  ;;  %v748_v40 = vld [vmem:[#allocation2 + $0x1f8] sm:$0xff]  ;;  %v747_v41 = vld [vmem:[#allocation2 + $0x1f0] sm:$0xff]  ;;  %p1192_p10 = pneg %p1191_p9 }
  0x32   : > { %770 = vmatpush1.msra.mxu0 %v707_v17  ;;  %v746_v42 = vld [vmem:[#allocation2 + $0x1e8] sm:$0xff]  ;;  %v745_v43 = vld [vmem:[#allocation2 + $0x1e0] sm:$0xff]  ;;  %v744_v44 = vld [vmem:[#allocation2 + $0x1d8] sm:$0xff] }
  0x33   : > { %771 = vmatprep.subr.mxu0 %v706_v18  ;;  %v743_v45 = vld [vmem:[#allocation2 + $0x1d0] sm:$0xff]  ;;  %v742_v46 = vld [vmem:[#allocation2 + $0x1c8] sm:$0xff]  ;;  %v741_v47 = vld [vmem:[#allocation2 + $0x1c0] sm:$0xff]  ;;  %p1199_p0 = pnand %p1198_p13, %p1192_p10 }
  0x34   : > { %772 = vmatpush1.msra.mxu0 %v705_v19  ;;  %v740_v48 = vld [vmem:[#allocation2 + $0x1b8] sm:$0xff]  ;;  %v739_v49 = vld [vmem:[#allocation2 + $0x1b0] sm:$0xff]  ;;  %v738_v50 = vld [vmem:[#allocation2 + $0x1a8] sm:$0xff] }
  0x35   : > { %773 = vmatprep.subr.mxu0 %v704_v20  ;;  %v737_v51 = vld [vmem:[#allocation2 + $0x1a0] sm:$0xff]  ;;  %v736_v52 = vld [vmem:[#allocation2 + $0x198] sm:$0xff]  ;;  %v436_v61 = vld [vmem:[%s1593_s8 + $0x8] sm:$0xf] }
  0x36   : > { %774 = vmatpush1.msra.mxu0 %v703_v21  ;;  %v1034_v53 = vld [vmem:[%s1587_s2] ss:$0 sm:$0xff]  ;;  %v599_v63 = vld [vmem:[%s1588_s3 + $0x38] sm:$0xff]  ;;  %v598_v1 = vld [vmem:[%s1588_s3 + $0x30] sm:$0xff] }
  0x37   : > { %775 = vmatprep.subr.mxu0 %v702_v22  ;;  %v597_v2 = vld [vmem:[%s1588_s3 + $0x28] sm:$0xff]  ;;  %v596_v3 = vld [vmem:[%s1588_s3 + $0x20] sm:$0xff]  ;;  %v595_v4 = vld [vmem:[%s1588_s3 + $0x18] sm:$0xff] }
  0x38   : > { %776 = vmatpush1.msra.mxu0 %v701_v23  ;;  %v594_v6 = vld [vmem:[%s1588_s3 + $0x10] sm:$0xff]  ;;  %v593_v7 = vld [vmem:[%s1588_s3 + $0x8] sm:$0xff]  ;;  %v592_v8 = vld [vmem:[%s1588_s3] sm:$0xff] }
  0x39   : > { %777 = vmatprep.subr.mxu0 %v700_v24  ;;  %v734_v9 = vld [vmem:[#allocation2 + $0x188] sm:$0xff]  ;;  %v733_v10 = vld [vmem:[#allocation2 + $0x180] sm:$0xff]  ;;  %v732_v11 = vld [vmem:[#allocation2 + $0x178] sm:$0xff] }
  0x3a   : > { %778 = vmatpush1.msra.mxu0 %v699_v25  ;;  %v731_v12 = vld [vmem:[#allocation2 + $0x170] sm:$0xff]  ;;  %v730_v13 = vld [vmem:[#allocation2 + $0x168] sm:$0xff]  ;;  %v729_v14 = vld [vmem:[#allocation2 + $0x160] sm:$0xff] }
  0x3b   : > { %779 = vmatprep.subr.mxu0 %v698_v26  ;;  %v728_v15 = vld [vmem:[#allocation2 + $0x158] sm:$0xff]  ;;  %v727_v16 = vld [vmem:[#allocation2 + $0x150] sm:$0xff]  ;;  %v726_v17 = vld [vmem:[#allocation2 + $0x148] sm:$0xff] }
  0x3c   : > { %780 = vmatpush1.msra.mxu0 %v697_v27  ;;  %v725_v18 = vld [vmem:[#allocation2 + $0x140] sm:$0xff]  ;;  %v724_v19 = vld [vmem:[#allocation2 + $0x138] sm:$0xff]  ;;  %v723_v20 = vld [vmem:[#allocation2 + $0x130] sm:$0xff] }
  0x3d   : > { %781 = vmatprep.subr.mxu0 %v696_v28  ;;  %v722_v21 = vld [vmem:[#allocation2 + $0x128] sm:$0xff]  ;;  %v721_v22 = vld [vmem:[#allocation2 + $0x120] sm:$0xff]  ;;  %v720_v23 = vld [vmem:[#allocation2 + $0x118] sm:$0xff] }
  0x3e   : > { %782 = vmatpush1.msra.mxu0 %v695_v29  ;;  %v719_v24 = vld [vmem:[#allocation2 + $0x110] sm:$0xff]  ;;  %v718_v25 = vld [vmem:[#allocation2 + $0x108] sm:$0xff]  ;;  %v717_v26 = vld [vmem:[#allocation2 + $0x100] sm:$0xff] }
  0x3f   : > { %783 = vmatprep.subr.mxu0 %v694_v30  ;;  %v867_v27 = vld [vmem:[%s1592_s7 + $0xf8] sm:$0xff]  ;;  %v866_v29 = vld [vmem:[%s1592_s7 + $0xf0] sm:$0xff] }
  0x40   : > { %784 = vmatpush1.msra.mxu0 %v693_v31  ;;  %v851_v28 = vld [vmem:[%s1592_s7 + $0x78] sm:$0xff]  ;;  %v850_v30 = vld [vmem:[%s1592_s7 + $0x70] sm:$0xff]  ;;  %v865_v31 = vld [vmem:[%s1592_s7 + $0xe8] sm:$0xff] }
  0x41   : > { %785 = vmatprep.subr.mxu0 %v692_v32  ;;  %v849_v32 = vld [vmem:[%s1592_s7 + $0x68] sm:$0xff] }
  0x42   : > { %786 = vmatpush1.msra.mxu0 %v691_v33  ;;  %v864_v33 = vld [vmem:[%s1592_s7 + $0xe0] sm:$0xff] }
  0x43   : > { %787 = vmatprep.subr.mxu0 %v690_v34  ;;  %v848_v34 = vld [vmem:[%s1592_s7 + $0x60] sm:$0xff] }
  0x44   : > { %788 = vmatpush1.msra.mxu0 %v689_v35  ;;  %v863_v35 = vld [vmem:[%s1592_s7 + $0xd8] sm:$0xff] }
  0x45   : > { %789 = vmatprep.subr.mxu0 %v688_v36  ;;  %v847_v36 = vld [vmem:[%s1592_s7 + $0x58] sm:$0xff] }
  0x46   : > { %790 = vmatpush1.msra.mxu0 %v687_v37  ;;  %v862_v37 = vld [vmem:[%s1592_s7 + $0xd0] sm:$0xff] }
  0x47   : > { %791 = vmatprep.subr.mxu0 %v686_v38  ;;  %v846_v38 = vld [vmem:[%s1592_s7 + $0x50] sm:$0xff] }
  0x48   : > { %792 = vmatpush1.msra.mxu0 %v685_v39  ;;  %v861_v39 = vld [vmem:[%s1592_s7 + $0xc8] sm:$0xff] }
  0x49   : > { %793 = vmatprep.subr.mxu0 %v748_v40  ;;  %v845_v40 = vld [vmem:[%s1592_s7 + $0x48] sm:$0xff] }
  0x4a   : > { %794 = vmatpush2.msra.mxu0 %v747_v41  ;;  %v860_v41 = vld [vmem:[%s1592_s7 + $0xc0] sm:$0xff] }
  0x4b   : > { %795 = vmatprep.subr.mxu0 %v746_v42  ;;  %v844_v42 = vld [vmem:[%s1592_s7 + $0x40] sm:$0xff] }
  0x4c   : > { %796 = vmatpush2.msra.mxu0 %v745_v43  ;;  %v859_v43 = vld [vmem:[%s1592_s7 + $0xb8] sm:$0xff] }
  0x4d   : > { %797 = vmatprep.subr.mxu0 %v744_v44  ;;  %v843_v44 = vld [vmem:[%s1592_s7 + $0x38] sm:$0xff] }
  0x4e   : > { %798 = vmatpush2.msra.mxu0 %v743_v45  ;;  %v858_v45 = vld [vmem:[%s1592_s7 + $0xb0] sm:$0xff] }
  0x4f   : > { %799 = vmatprep.subr.mxu0 %v742_v46  ;;  %v842_v46 = vld [vmem:[%s1592_s7 + $0x30] sm:$0xff] }
  0x50   : > { %800 = vmatpush2.msra.mxu0 %v741_v47  ;;  %v857_v47 = vld [vmem:[%s1592_s7 + $0xa8] sm:$0xff] }
  0x51   : > { %801 = vmatprep.subr.mxu0 %v740_v48  ;;  %v841_v48 = vld [vmem:[%s1592_s7 + $0x28] sm:$0xff] }
  0x52   : > { %802 = vmatpush2.msra.mxu0 %v739_v49  ;;  %v602_v49 = vlaneseq }
  0x53   : > { %803 = vmatprep.subr.mxu0 %v738_v50 }
  0x54   : > { %804 = vmatpush2.msra.mxu0 %v737_v51 }
  0x55   : > { %805 = vmatprep.subr.mxu0 %v736_v52  ;;  %v603_v52 = vshrl.u32 %v602_v49, 7 }
  0xed   : > { %v425_v54 = vpop.f32.mrf.mxu1 }
  0xee   : > { %v426_v55 = vadd.f32 %v1034_v53, %v425_v54 }
  0xef   : > { %v1098_v56 = vpop.f32.mrf.mxu1 }
  0xf0   : > { %v429_v57 = vsub.f32 0.0, %v426_v55  ;;  %v604_v55 = vsub.s32 0, %v603_v52  ;;  %v600_v56 = vld [vmem:[%s1589_s4] sm:$0x3] }
  0xf2   : > { %v430_v58 = vmul.f32 1.442695, %v429_v57  ;;  %v608_v57 = vsub.s32 1, %v603_v52 }
  0xf4   : > { %1159 = vpow2.f32 %v430_v58  ;;  %v605_v58 = vrot.slane %v600_v56, %v604_v55 }
 0x101   : > { %v1160_v59 = vpop.eup %1159 }
 0x102   : > { %v432_v60 = vadd.f32 1.0, %v1160_v59  ;;  %v609_v59 = vrot.slane %v600_v56, %v608_v57 }
 0x104   : > { %1161 = vrcp.f32 %v432_v60 }
 0x111   : > { %v1162_v62 = vpop.eup %1161 }
 0x112   : > { %1038 = vmatmul.mubr.msk.f32.vlgmr.msra.gmra.mxu1 %vm440_vm3, %v1162_v62 }
 0x113   : > { %1100 = vmatpush3.msk.msra.mxu1 %vm444_vm2, %v436_v61  ;;  %1101 = vmatprep.mubr.msk.f32.mxu1 %vm1259_vm0, %v1258_v0 }
 0x114   : > { %636 = vmatprep.subr.mxu1 %v599_v63 }
 0x116   : > { %1102 = vmatmul.mubr.msk.f32.vlgmr.msra.gmra.mxu1 %vm440_vm3, %v1162_v62 }
 0x117   : > { %637 = vmatpush1.msra.mxu1 %v598_v1  ;;  %676 = vmatprep.mubr.f32.mxu1 %v1258_v0  ;;  %v735_v0 = vld [vmem:[#allocation2 + $0x190] sm:$0xff] }
 0x118   : > { %638 = vmatprep.subr.mxu1 %v597_v2  ;;  %806 = vmatpush2.msra.mxu0 %v735_v0  ;;  %v838_v0 = vld [vmem:[%s1592_s7 + $0x10] sm:$0xff] }
 0x119   : > { %639 = vmatpush1.msra.mxu1 %v596_v3  ;;  %807 = vmatprep.subr.mxu0 %v734_v9  ;;  %v856_v3 = vld [vmem:[%s1592_s7 + $0xa0] sm:$0xff]  ;;  %v853_v9 = vld [vmem:[%s1592_s7 + $0x88] sm:$0xff] }
 0x11a   : > { %640 = vmatprep.subr.mxu1 %v595_v4  ;;  %808 = vmatpush2.msra.mxu0 %v733_v10  ;;  %v840_v4 = vld [vmem:[%s1592_s7 + $0x20] sm:$0xff]  ;;  %v837_v10 = vld [vmem:[%s1592_s7 + $0x8] sm:$0xff] }
 0x11b   : > { %641 = vmatpush1.msra.mxu1 %v594_v6  ;;  %809 = vmatprep.subr.mxu0 %v732_v11  ;;  %v855_v6 = vld [vmem:[%s1592_s7 + $0x98] sm:$0xff]  ;;  %v852_v11 = vld [vmem:[%s1592_s7 + $0x80] sm:$0xff] }
 0x11c   : > { %642 = vmatprep.subr.mxu1 %v593_v7  ;;  %810 = vmatpush2.msra.mxu0 %v731_v12  ;;  %v839_v7 = vld [vmem:[%s1592_s7 + $0x18] sm:$0xff]  ;;  %v836_v12 = vld [vmem:[%s1592_s7] sm:$0xff] }
 0x11d   : > { %643 = vmatpush1.msra.mxu1 %v592_v8  ;;  %811 = vmatprep.subr.mxu0 %v730_v13  ;;  %v854_v8 = vld [vmem:[%s1592_s7 + $0x90] sm:$0xff]  ;;  %v749_v13 = vld [vmem:[%s1591_s6] sm:$0x3] }
 0x11e   : > { %1041 = vmatmul.mubr.msk.f32.vlgmr.msra.gmra.mxu1 %vm355_vm1, %v1399_v5  ;;  %812 = vmatpush2.msra.mxu0 %v729_v14  ;;  %v754_v14 = vrot.slane %v749_v13, %v604_v55 }
 0x11f   : > { %813 = vmatprep.subr.mxu0 %v728_v15  ;;  %1053 = vmatprep.subr.mxu1 %v867_v27  ;;  %v758_v15 = vrot.slane %v749_v13, %v608_v57 }
 0x120   : > { %814 = vmatpush2.msra.mxu0 %v727_v16  ;;  %1054 = vmatpush3.msra.mxu1 %v851_v28 }
 0x121   : > { %815 = vmatprep.subr.mxu0 %v726_v17  ;;  %1055 = vmatprep.subr.mxu1 %v866_v29 }
 0x122   : > { %816 = vmatpush2.msra.mxu0 %v725_v18  ;;  %1056 = vmatpush3.msra.mxu1 %v850_v30 }
 0x123   : > { %817 = vmatprep.subr.mxu0 %v724_v19  ;;  %1057 = vmatprep.subr.mxu1 %v865_v31 }
 0x124   : > { %818 = vmatpush2.msra.mxu0 %v723_v20  ;;  %1058 = vmatpush3.msra.mxu1 %v849_v32 }
 0x125   : > { %819 = vmatprep.subr.mxu0 %v722_v21  ;;  %1059 = vmatprep.subr.mxu1 %v864_v33 }
 0x126   : > { %820 = vmatpush2.msra.mxu0 %v721_v22  ;;  %1060 = vmatpush3.msra.mxu1 %v848_v34 }
 0x127   : > { %821 = vmatprep.subr.mxu0 %v720_v23  ;;  %1061 = vmatprep.subr.mxu1 %v863_v35 }
 0x128   : > { %822 = vmatpush2.msra.mxu0 %v719_v24  ;;  %1062 = vmatpush3.msra.mxu1 %v847_v36 }
 0x129   : > { %823 = vmatprep.subr.mxu0 %v718_v25  ;;  %1063 = vmatprep.subr.mxu1 %v862_v37 }
 0x12a   : > { %824 = vmatpush2.msra.mxu0 %v717_v26  ;;  %1064 = vmatpush3.msra.mxu1 %v846_v38 }
 0x12b   : > { %1065 = vmatprep.subr.mxu1 %v861_v39 }
 0x12c   : > { %1066 = vmatpush3.msra.mxu1 %v845_v40 }
 0x12d   : > { %1067 = vmatprep.subr.mxu1 %v860_v41 }
 0x12e   : > { %1068 = vmatpush3.msra.mxu1 %v844_v42 }
 0x12f   : > { %1069 = vmatprep.subr.mxu1 %v859_v43 }
 0x130   : > { %1070 = vmatpush3.msra.mxu1 %v843_v44 }
 0x131   : > { %1071 = vmatprep.subr.mxu1 %v858_v45 }
 0x132   : > { %1072 = vmatpush3.msra.mxu1 %v842_v46 }
 0x133   : > { %1073 = vmatprep.subr.mxu1 %v857_v47 }
 0x134   : > { %1074 = vmatpush3.msra.mxu1 %v841_v48 }
 0x135   : > { %1075 = vmatprep.subr.mxu1 %v856_v3 }
 0x136   : > { %1076 = vmatpush3.msra.mxu1 %v840_v4 }
 0x137   : > { %1077 = vmatprep.subr.mxu1 %v855_v6 }
 0x138   : > { %1078 = vmatpush3.msra.mxu1 %v839_v7 }
 0x139   : > { %1079 = vmatprep.subr.mxu1 %v854_v8 }
 0x13a   : > { %1080 = vmatpush3.msra.mxu1 %v838_v0 }
 0x13b   : > { %1081 = vmatprep.subr.mxu1 %v853_v9 }
 0x13c   : > { %1082 = vmatpush3.msra.mxu1 %v837_v10 }
 0x13d   : > { %1083 = vmatprep.subr.mxu1 %v852_v11 }
 0x13e   : > { %1084 = vmatpush3.msra.mxu1 %v836_v12 }
 0x1d2   : > { %v517_v50 = vpop.f32.mrf.mxu1 }
 0x1d4   : > { %v519_v51 = vpop.f32.mrf.mxu1 }
 0x1d6   : > { %v588_v53 = vpop.f32.mrf.mxu1 }
 0x1d8   : > { %v1103_v54 = vpop.f32.mrf.mxu1 }
 0x1de   : > { %v678_v60 = vpop.f32.mrf.mxu1 }
 0x1df   : > { %v679_v61 = vadd.f32 %v678_v60, %v605_v58 }
 0x1e0   : > { %v680_v62 = vpop.f32.mrf.mxu1 }
 0x1e1   : > { %v681_v63 = vadd.f32 %v680_v62, %v609_v59  ;;  %v683_v2 = vmax.f32 %v679_v61, 0.0 }
 0x1e3   : > { %v684_v1 = vmax.f32 %v681_v63, 0.0 }
 0x1e5   : > { %825 = vmatprep.mubr.f32.mxu0 %v684_v1 }
 0x1e6   : > { %826 = vmatmul.mubr.f32.vlgmr.msra.gmra.mxu0 %v683_v2 }
 0x2a6   : > { %v827_v16 = vpop.f32.mrf.mxu0 }
 0x2a7   : > { %v828_v17 = vadd.f32 %v827_v16, %v754_v14 }
 0x2a8   : > { %v829_v18 = vpop.f32.mrf.mxu0 }
 0x2a9   : > { %v830_v19 = vadd.f32 %v829_v18, %v758_v15  ;;  %v832_v20 = vmax.f32 %v828_v17, 0.0 }
 0x2ab   : > { %v833_v21 = vmax.f32 %v830_v19, 0.0  ;;  %v834_v23 = vmul.f32 %v832_v20, %v517_v50 }
 0x2ad   : > { %v835_v22 = vmul.f32 %v833_v21, %v519_v51 }
 0x2af   : > { %932 = vmatprep.mubr.f32.mxu1 %v835_v22 }
 0x2b0   : > { %933 = vmatmul.mubr.f32.vlgmr.msra.gmra.mxu1 %v834_v23 }
 0x370   : > { %v1085_v24 = vpop.f32.mrf.mxu1 }
 0x372   : > { %v1086_v25 = vpop.f32.mrf.mxu1 }
 0x373   : > { %v1087_v26 = vadd.f32 %v1086_v25, %v1085_v24 }
 0x375   : > { %v938_v27 = vadd.f32 %v1087_v26, %v1399_v5 }
 0x377   : > { %v939_v28 = vadd.f32 %v938_v27, %v588_v53 }
 0x379   : > { %940 = vst.msk [vmem:[%s338_s27] sm:$0xff] %vm355_vm1, %v939_v28 }
 0x37a   : > { %1202 = shalt.err (!%p1199_p0)
}
 0x37b   : > { %s1203_s25 = scalar_lea.hbm %s953_s16, 128  ;;  %s1207_s27 = scalar_lea.hbm %s1594_s9, 256 }
 0x37c   : > { %p1204_p1 = scmp.ne.s32.totalorder %s953_s16, %s1203_s25  ;;  %p1208_p4 = scmp.lt.s32.totalorder %s953_s16, %s1594_s9 }
 0x37d   : > { %p1209_p7 = scmp.lt.s32.totalorder %s1207_s27, %s1203_s25 }
 0x37e   : > { %p1205_p2 = pnand %p1204_p1, %p1349_p5 }
 0x37f   : > { %p1210_p8 = por %p1209_p7, %p1208_p4 }
 0x380   : > { %p1206_p3 = pneg %p1205_p2 }
 0x382   : > { %p1211_p6 = pnand %p1210_p8, %p1206_p3 }
 0x384   : > { %1214 = shalt.err (!%p1211_p6)
}
 0x385   : > { %1108 = dma.vmem_to_hbm [thread:$0]  (%p1349_p5), %s956_s28, 128, %s953_s16, %s942_s17  }
 0x386 PF: > { %p1120_p9 = scmp.ge.s32.totalorder %s1253_s12, 2  ;;  %s967_s21 = sand.u32 1, %s1241_s30  }
 0x387   : > { %p1598_p10 = scmp.ne.s32.totalorder %s1596_s20, 0  ;;  %s968_s22 = scalar_lea.sflag [#allocation4], %s967_s21 }
 0x389   : > { %p1115_p11 = pnand %p1120_p9, %p1598_p10 }
 0x38b   : > { %p1116_p12 = pneg %p1115_p11 }
 0x38d   : > { %1236 = dma.done.wait (%p1116_p12), %s968_s22, 128  }
 0x38e   : > { %1238 = vsyncadd (%p1116_p12), %s968_s22, 4294967168  ;;  %p20_p13 = scmp.ge.s32.totalorder %s1336_s15, 4   ;;  %s1599_s30 = smov %s1245_s10 }
 0x38f   : > { %s1600_s10 = smov %s1249_s11  ;;  %s1601_s11 = smov %s1347_s18 }
 0x390   : > { %s1602_s12 = smov %s1336_s15  ;;  %22 = sbr.rel (!%p20_p13) target bundleno = 4 (0x4), region = 96 }
 0x395   :  { %973 = vsyncpa [#allocation3], 1 }
 0x396   :  { %975 = vsyncpa [#allocation3 + $0x1], 1 }
 0x397   :  { %976 = vsyncpa [#allocation4], 1 }
 0x398   :  { %978 = vsyncpa [#allocation4 + $0x1], 1 }

</bundles_post_ra>
